<compile_context>
chip_gen: v7x
topology: tpu7x:2x2x1
jax: 0.10.0
libtpu: 0.0.40
codegen_flags: <defaults>
</compile_context>

<pallas_src>
import jax
import jax.numpy as jnp
from jax.experimental import pallas as pl
from jax.experimental.pallas import tpu as pltpu

COMPUTE_DTYPE = jnp.bfloat16   # MXU operand dtype; accumulation stays float32


def _conv_out_len(t, k, s, d, p):
    return (t + 2 * p - d * (k - 1) - 1) // s + 1


def _round_up(x, m):
    return ((x + m - 1) // m) * m


# ----------------------------------------------------------------------------
# Plan construction: flatten the encoder into a static list of conv "ops".
# ----------------------------------------------------------------------------
def build_plan(params):
    ops, wb = [], []

    def add_conv(p, *, k, stride=1, dil=1, pad=0,
                 relu_in=False, relu_out=False, add_res=False):
        ops.append(dict(kind="conv", k=k, stride=stride, dil=dil, pad=pad,
                        relu_in=relu_in, relu_out=relu_out, add_res=add_res))
        wb.append((p["w"], p["b"]))

    # init_conv: Conv1d(k=3, p=1) + ReLU (ReLU fused as relu_out)
    add_conv(params["init"], k=3, pad=1, relu_out=True)
    for stage in params["stages"]:
        # stage projection conv
        add_conv(stage["proj"], k=3, pad=1)
        # Resnet1D block: relu -> conv(k3, dil d, pad d) -> relu -> conv(k1) -> +x
        for blk in stage["res_blocks"]:
            d = blk["dilation"]
            ops.append(dict(kind="save_res"))
            add_conv(blk["conv1"], k=3, dil=d, pad=d, relu_in=True)
            add_conv(blk["conv2"], k=1, relu_in=True, add_res=True)
        # optional downsample: Conv1d(k=4, s=2, p=1)
        if stage["down"] is not None:
            add_conv(stage["down"], k=4, stride=2, pad=1)
    # post_conv
    add_conv(params["post"], k=3, pad=1)
    return ops, wb


# ----------------------------------------------------------------------------
# Fused encoder kernel (one batch-block per grid step).
# ----------------------------------------------------------------------------
def make_encoder_kernel(plan, align, b_blk):
    """Kernel args: (x_ref, w0, b0, w1, b1, ..., out_ref, pad_scratch)."""

    def kernel(x_ref, *rest):
        pad_ref = rest[-1]          # f32 VMEM staging buffer for padded inputs
        out_ref = rest[-2]
        wb_refs = rest[:-2]

        wi = 0
        a = x_ref[...]              # (b_blk, T, C_in) float32
        res = None

        for op in plan:
            if op["kind"] == "save_res":
                res = a
                continue

            w_ref, b_ref = wb_refs[wi], wb_refs[wi + 1]
            wi += 2
            K, s, d, p = op["k"], op["stride"], op["dil"], op["pad"]
            _, t_in, c_in = a.shape
            c_out = w_ref.shape[1]                    # w pre-packed (K*C_in, C_out)
            t_out = _conv_out_len(t_in, K, s, d, p)

            h = jnp.maximum(a, 0.0) if op["relu_in"] else a

            if K == 1 and p == 0 and s == 1:
                # 1x1 conv: im2col LHS is just the activation; no scratch needed.
                lhs = h.astype(COMPUTE_DTYPE)
            else:
                base = align - p                      # row of padded[0] in scratch
                if p > 0:
                    # Zero ONLY the pad rows; the middle is overwritten by h.
                    zpad = jnp.zeros((b_blk, p, c_in), jnp.float32)
                    pad_ref[:, base:base + p, 0:c_in] = zpad
                    pad_ref[:, align + t_in:align + t_in + p, 0:c_in] = zpad
                pad_ref[:, align:align + t_in, 0:c_in] = h

                if s == 1:
                    # One window load; taps are value slices of it.
                    win = pad_ref[:, base:base + t_in + 2 * p, 0:c_in]
                    taps = [win[:, k * d:k * d + t_out, :] for k in range(K)]
                else:
                    # Strided conv: read exactly the t_out needed rows per tap
                    # with a strided ref load (no row-selection matmul, no
                    # wasted output rows).  Full-lane read, then lane-slice.
                    taps = [
                        pad_ref[:, pl.ds(base + k * d, t_out, stride=s), :][:, :, 0:c_in]
                        for k in range(K)
                    ]
                # im2col LHS: (b_blk, t_out, K*C_in); single bf16 cast per layer.
                lhs = jnp.concatenate(taps, axis=-1).astype(COMPUTE_DTYPE)

            # Single MXU dot per layer, f32 accumulation, M = b_blk * t_out.
            lhs2 = lhs.reshape(b_blk * t_out, K * c_in)
            acc = jnp.dot(lhs2, w_ref[...], preferred_element_type=jnp.float32)
            acc = acc.reshape(b_blk, t_out, c_out) + b_ref[...]   # (1, C_out) bcast

            if op["add_res"]:
                acc = acc + res
            if op["relu_out"]:
                acc = jnp.maximum(acc, 0.0)
            a = acc

        out_ref[...] = a.astype(out_ref.dtype)

    return kernel


def _pick_batch_block(batch, t_len, m_target=256):
    """Largest batch block (divisor of batch) keeping M = b_blk*T near target,
    while preserving >= 2 grid steps when possible (v7x has 2 TensorCores)."""
    divs = [d for d in range(1, batch + 1) if batch % d == 0]
    fit = [d for d in divs if d * t_len <= m_target] or [1]
    b_blk = max(fit)
    if batch > 1 and batch // b_blk < 2:
        two_step = [d for d in divs if batch // d >= 2]
        if two_step:
            b_blk = max(two_step)
    return b_blk


# ----------------------------------------------------------------------------
# Encoder forward (semantics of Encoder.forward with activation='relu', norm=None)
# ----------------------------------------------------------------------------
def encoder_forward(params, x_bct, m_target=256):
    """x_bct: (B, C_in, T) as in PyTorch.  Returns (B, C_out, T_out)."""
    x = jnp.transpose(x_bct, (0, 2, 1)).astype(jnp.float32)   # (B, T, C)
    B, T, C_in = x.shape

    plan, wb = build_plan(params)

    # Static shape bookkeeping: time-length evolution, scratch size, out dims.
    t_cur, c_cur = T, C_in
    layer_tp = []                     # (t_in, pad) per conv
    max_c = C_in
    wi = 0
    for op in plan:
        if op["kind"] != "conv":
            continue
        w, _ = wb[wi]
        wi += 1
        K, s, d, p = op["k"], op["stride"], op["dil"], op["pad"]
        assert w.shape[0] == K and w.shape[1] == c_cur
        layer_tp.append((t_cur, p))
        max_c = max(max_c, c_cur)
        t_cur = _conv_out_len(t_cur, K, s, d, p)
        c_cur = w.shape[2]
    T_out, C_out = t_cur, c_cur

    max_pad = max(p for _, p in layer_tp)
    align = max(8, _round_up(max_pad, 8))             # aligned activation store
    t_buf = _round_up(max(align + t + p for t, p in layer_tp), 8)
    c_buf = max(128, _round_up(max_c, 128))           # scratch lanes

    b_blk = _pick_batch_block(B, T, m_target)
    n_blocks = B // b_blk

    # Flat kernel inputs: x, then (w, b) per conv. Weights pre-packed to the
    # im2col layout (K*C_in, C_out) and cast to bf16; biases stay f32 rows.
    flat_args = [x]
    in_specs = [pl.BlockSpec((b_blk, T, C_in), lambda i: (i, 0, 0))]
    for w, b in wb:
        K, cin, cout = w.shape
        w2 = w.reshape(K * cin, cout).astype(COMPUTE_DTYPE)   # row = k*cin + ci
        b2 = b.reshape(1, -1).astype(jnp.float32)
        flat_args += [w2, b2]
        in_specs += [pl.BlockSpec(w2.shape, lambda i: (0, 0)),
                     pl.BlockSpec(b2.shape, lambda i: (0, 0))]

    kernel = make_encoder_kernel(plan, align, b_blk)

    out = pl.pallas_call(
        kernel,
        grid=(n_blocks,),
        in_specs=in_specs,
        out_specs=pl.BlockSpec((b_blk, T_out, C_out), lambda i: (i, 0, 0)),
        out_shape=jax.ShapeDtypeStruct((B, T_out, C_out), jnp.float32),
        scratch_shapes=[pltpu.VMEM((b_blk, t_buf, c_buf), jnp.float32)],
        compiler_params=pltpu.CompilerParams(
            dimension_semantics=("parallel",)),
    )(*flat_args)
    return jnp.transpose(out, (0, 2, 1))


# ----------------------------------------------------------------------------
# Deterministic parameter construction (synthetic; mirrors Encoder.__init__)
# ----------------------------------------------------------------------------
def _conv_param(key, k, cin, cout):
    kw, kb = jax.random.split(key)
    return {
        # (K, C_in, C_out) == pytorch Conv1d weight.transpose(2, 1, 0)
        "w": jax.random.normal(kw, (k, cin, cout), jnp.float32) * 0.05,
        "b": jax.random.normal(kb, (cout,), jnp.float32) * 0.05,
    }


def init_encoder_params(key, input_dim, output_dim, emb_dim_encoder, downsample,
                        dilation_growth_rate, depth_per_res_block):
    assert len(downsample) == len(emb_dim_encoder) - 1
    keys = iter(jax.random.split(key, 1024))
    params = {"init": _conv_param(next(keys), 3, input_dim, emb_dim_encoder[0]),
              "stages": []}
    for i in range(len(emb_dim_encoder) - 1):
        cin, cout = emb_dim_encoder[i], emb_dim_encoder[i + 1]
        stage = {"proj": _conv_param(next(keys), 3, cin, cout),
                 "res_blocks": [], "down": None}
        # Resnet1D builds blocks with dilation = rate**depth, then reverses.
        dilations = [dilation_growth_rate ** d
                     for d in range(depth_per_res_block)][::-1]
        for d in dilations:
            stage["res_blocks"].append({
                "dilation": d,
                "conv1": _conv_param(next(keys), 3, cout, cout),
                "conv2": _conv_param(next(keys), 1, cout, cout),
            })
        if downsample[i]:
            stage["down"] = _conv_param(next(keys), 4, 2 * 0 + cout, cout)
        params["stages"].append(stage)
    params["post"] = _conv_param(next(keys), 3, emb_dim_encoder[-1], output_dim)
    return params


# ----------------------------------------------------------------------------
if __name__ == "__main__":
    key = jax.random.PRNGKey(0)
    kparam, kx = jax.random.split(key)

    # Small config consistent with the module's structure.
    input_dim, output_dim = 8, 4
    emb_dim_encoder = (32, 16, 8)
    downsample = (0, 1)
    dilation_growth_rate = 2
    depth_per_res_block = 2

    params = init_encoder_params(kparam, input_dim, output_dim,
                                 emb_dim_encoder, downsample,
                                 dilation_growth_rate, depth_per_res_block)

    B, T = 2, 16
    x = jax.random.normal(kx, (B, input_dim, T), jnp.float32)

    out = encoder_forward(params, x)
    jax.block_until_ready(out)

    # one downsample stage halves T: (B, output_dim, T // 2)
    assert out.shape == (B, output_dim, T // 2), out.shape
    assert bool(jnp.all(jnp.isfinite(out)))
    print("KERNEL_OK")
</pallas_src>

<mosaic_0001>
module attributes {stable_mosaic.version = 11 : i64} {
  func.func @kernel(%arg0: i32, %arg1: memref<1x16x8xf32, #tpu.memory_space<vmem>>, %arg2: memref<24x32xbf16, #tpu.memory_space<vmem>>, %arg3: memref<1x32xf32, #tpu.memory_space<vmem>>, %arg4: memref<96x16xbf16, #tpu.memory_space<vmem>>, %arg5: memref<1x16xf32, #tpu.memory_space<vmem>>, %arg6: memref<48x16xbf16, #tpu.memory_space<vmem>>, %arg7: memref<1x16xf32, #tpu.memory_space<vmem>>, %arg8: memref<16x16xbf16, #tpu.memory_space<vmem>>, %arg9: memref<1x16xf32, #tpu.memory_space<vmem>>, %arg10: memref<48x16xbf16, #tpu.memory_space<vmem>>, %arg11: memref<1x16xf32, #tpu.memory_space<vmem>>, %arg12: memref<16x16xbf16, #tpu.memory_space<vmem>>, %arg13: memref<1x16xf32, #tpu.memory_space<vmem>>, %arg14: memref<48x8xbf16, #tpu.memory_space<vmem>>, %arg15: memref<1x8xf32, #tpu.memory_space<vmem>>, %arg16: memref<24x8xbf16, #tpu.memory_space<vmem>>, %arg17: memref<1x8xf32, #tpu.memory_space<vmem>>, %arg18: memref<8x8xbf16, #tpu.memory_space<vmem>>, %arg19: memref<1x8xf32, #tpu.memory_space<vmem>>, %arg20: memref<24x8xbf16, #tpu.memory_space<vmem>>, %arg21: memref<1x8xf32, #tpu.memory_space<vmem>>, %arg22: memref<8x8xbf16, #tpu.memory_space<vmem>>, %arg23: memref<1x8xf32, #tpu.memory_space<vmem>>, %arg24: memref<32x8xbf16, #tpu.memory_space<vmem>>, %arg25: memref<1x8xf32, #tpu.memory_space<vmem>>, %arg26: memref<24x4xbf16, #tpu.memory_space<vmem>>, %arg27: memref<1x4xf32, #tpu.memory_space<vmem>>, %arg28: memref<1x8x4xf32, #tpu.memory_space<vmem>>, %arg29: memref<1x32x128xf32, #tpu.memory_space<vmem>>) attributes {dimension_semantics = [#tpu.dimension_semantics<parallel>], iteration_bounds = array<i64: 2>, scalar_prefetch = 0 : i64, scratch_operands = 1 : i64, tpu.core_type = #tpu.core_type<tc>, window_params = [{transform_indices = @transform_0, window_bounds = array<i64: 1, 16, 8>}, {pipeline_mode = #tpu.pipeline_mode<synchronous>, transform_indices = @transform_1, window_bounds = array<i64: 24, 32>}, {pipeline_mode = #tpu.pipeline_mode<synchronous>, transform_indices = @transform_2, window_bounds = array<i64: 1, 32>}, {pipeline_mode = #tpu.pipeline_mode<synchronous>, transform_indices = @transform_3, window_bounds = array<i64: 96, 16>}, {pipeline_mode = #tpu.pipeline_mode<synchronous>, transform_indices = @transform_4, window_bounds = array<i64: 1, 16>}, {pipeline_mode = #tpu.pipeline_mode<synchronous>, transform_indices = @transform_5, window_bounds = array<i64: 48, 16>}, {pipeline_mode = #tpu.pipeline_mode<synchronous>, transform_indices = @transform_6, window_bounds = array<i64: 1, 16>}, {pipeline_mode = #tpu.pipeline_mode<synchronous>, transform_indices = @transform_7, window_bounds = array<i64: 16, 16>}, {pipeline_mode = #tpu.pipeline_mode<synchronous>, transform_indices = @transform_8, window_bounds = array<i64: 1, 16>}, {pipeline_mode = #tpu.pipeline_mode<synchronous>, transform_indices = @transform_9, window_bounds = array<i64: 48, 16>}, {pipeline_mode = #tpu.pipeline_mode<synchronous>, transform_indices = @transform_10, window_bounds = array<i64: 1, 16>}, {pipeline_mode = #tpu.pipeline_mode<synchronous>, transform_indices = @transform_11, window_bounds = array<i64: 16, 16>}, {pipeline_mode = #tpu.pipeline_mode<synchronous>, transform_indices = @transform_12, window_bounds = array<i64: 1, 16>}, {pipeline_mode = #tpu.pipeline_mode<synchronous>, transform_indices = @transform_13, window_bounds = array<i64: 48, 8>}, {pipeline_mode = #tpu.pipeline_mode<synchronous>, transform_indices = @transform_14, window_bounds = array<i64: 1, 8>}, {pipeline_mode = #tpu.pipeline_mode<synchronous>, transform_indices = @transform_15, window_bounds = array<i64: 24, 8>}, {pipeline_mode = #tpu.pipeline_mode<synchronous>, transform_indices = @transform_16, window_bounds = array<i64: 1, 8>}, {pipeline_mode = #tpu.pipeline_mode<synchronous>, transform_indices = @transform_17, window_bounds = array<i64: 8, 8>}, {pipeline_mode = #tpu.pipeline_mode<synchronous>, transform_indices = @transform_18, window_bounds = array<i64: 1, 8>}, {pipeline_mode = #tpu.pipeline_mode<synchronous>, transform_indices = @transform_19, window_bounds = array<i64: 24, 8>}, {pipeline_mode = #tpu.pipeline_mode<synchronous>, transform_indices = @transform_20, window_bounds = array<i64: 1, 8>}, {pipeline_mode = #tpu.pipeline_mode<synchronous>, transform_indices = @transform_21, window_bounds = array<i64: 8, 8>}, {pipeline_mode = #tpu.pipeline_mode<synchronous>, transform_indices = @transform_22, window_bounds = array<i64: 1, 8>}, {pipeline_mode = #tpu.pipeline_mode<synchronous>, transform_indices = @transform_23, window_bounds = array<i64: 32, 8>}, {pipeline_mode = #tpu.pipeline_mode<synchronous>, transform_indices = @transform_24, window_bounds = array<i64: 1, 8>}, {pipeline_mode = #tpu.pipeline_mode<synchronous>, transform_indices = @transform_25, window_bounds = array<i64: 24, 4>}, {pipeline_mode = #tpu.pipeline_mode<synchronous>, transform_indices = @transform_26, window_bounds = array<i64: 1, 4>}, {transform_indices = @transform_27, window_bounds = array<i64: 1, 8, 4>}]} {
    %c0 = arith.constant 0 : index
    %c0_0 = arith.constant 0 : index
    %c0_1 = arith.constant 0 : index
    %0 = vector.load %arg1[%c0, %c0_0, %c0_1] : memref<1x16x8xf32, #tpu.memory_space<vmem>>, vector<1x16x8xf32>
    %cst = arith.constant 0.000000e+00 : f32
    %1 = vector.broadcast %cst : f32 to vector<1x1x8xf32>
    %c0_2 = arith.constant 0 : index
    %c7 = arith.constant 7 : index
    %c0_3 = arith.constant 0 : index
    %2 = vector.load %arg29[%c0_2, %c7, %c0_3] : memref<1x32x128xf32, #tpu.memory_space<vmem>>, vector<1x1x8xf32>
    tpu.vector_store %arg29[%c0_2, %c7, %c0_3], %1 {strides = array<i32>} : memref<1x32x128xf32, #tpu.memory_space<vmem>>, vector<1x1x8xf32>,
    %c0_4 = arith.constant 0 : index
    %c24 = arith.constant 24 : index
    %c0_5 = arith.constant 0 : index
    %3 = vector.load %arg29[%c0_4, %c24, %c0_5] : memref<1x32x128xf32, #tpu.memory_space<vmem>>, vector<1x1x8xf32>
    tpu.vector_store %arg29[%c0_4, %c24, %c0_5], %1 {strides = array<i32>} : memref<1x32x128xf32, #tpu.memory_space<vmem>>, vector<1x1x8xf32>,
    %c0_6 = arith.constant 0 : index
    %c8 = arith.constant 8 : index
    %c0_7 = arith.constant 0 : index
    %4 = vector.load %arg29[%c0_6, %c8, %c0_7] : memref<1x32x128xf32, #tpu.memory_space<vmem>>, vector<1x16x8xf32>
    tpu.vector_store %arg29[%c0_6, %c8, %c0_7], %0 {strides = array<i32>} : memref<1x32x128xf32, #tpu.memory_space<vmem>>, vector<1x16x8xf32>,
    %c0_8 = arith.constant 0 : index
    %c7_9 = arith.constant 7 : index
    %c0_10 = arith.constant 0 : index
    %5 = vector.load %arg29[%c0_8, %c7_9, %c0_10] : memref<1x32x128xf32, #tpu.memory_space<vmem>>, vector<1x18x8xf32>
    %6 = vector.extract_strided_slice %5 {offsets = [0, 0, 0], sizes = [1, 16, 8], strides = [1, 1, 1]} : vector<1x18x8xf32> to vector<1x16x8xf32>
    %7 = vector.extract_strided_slice %5 {offsets = [0, 1, 0], sizes = [1, 16, 8], strides = [1, 1, 1]} : vector<1x18x8xf32> to vector<1x16x8xf32>
    %8 = vector.extract_strided_slice %5 {offsets = [0, 2, 0], sizes = [1, 16, 8], strides = [1, 1, 1]} : vector<1x18x8xf32> to vector<1x16x8xf32>
    %9 = tpu.concatenate %6, %7, %8 in 2 : vector<1x16x8xf32>, vector<1x16x8xf32>, vector<1x16x8xf32> -> vector<1x16x24xf32>
    %10 = arith.truncf %9 : vector<1x16x24xf32> to vector<1x16x24xbf16>
    %11 = vector.shape_cast %10 : vector<1x16x24xbf16> to vector<16x24xbf16>
    %c0_11 = arith.constant 0 : index
    %c0_12 = arith.constant 0 : index
    %12 = vector.load %arg2[%c0_11, %c0_12] : memref<24x32xbf16, #tpu.memory_space<vmem>>, vector<24x32xbf16>
    %cst_13 = arith.constant dense<0.000000e+00> : vector<16x32xf32>
    %13 = tpu.matmul %11, %12, %cst_13 {dimension_numbers = #tpu.dot_dimension_numbers<[1], [0], [0], [1], [0, 0, 1, 1], [], []>} : vector<16x24xbf16>, vector<24x32xbf16>, vector<16x32xf32> -> vector<16x32xf32>
    %14 = vector.shape_cast %13 : vector<16x32xf32> to vector<1x16x32xf32>
    %c0_14 = arith.constant 0 : index
    %c0_15 = arith.constant 0 : index
    %15 = vector.load %arg3[%c0_14, %c0_15] : memref<1x32xf32, #tpu.memory_space<vmem>>, vector<1x32xf32>
    %16 = vector.shape_cast %15 : vector<1x32xf32> to vector<1x1x32xf32>
    %17 = vector.broadcast %16 : vector<1x1x32xf32> to vector<1x16x32xf32>
    %18 = arith.addf %14, %17 : vector<1x16x32xf32>
    %cst_16 = arith.constant 0.000000e+00 : f32
    %19 = vector.broadcast %cst_16 : f32 to vector<1x16x32xf32>
    %20 = arith.maximumf %18, %19 : vector<1x16x32xf32>
    %cst_17 = arith.constant 0.000000e+00 : f32
    %21 = vector.broadcast %cst_17 : f32 to vector<1x1x32xf32>
    %c0_18 = arith.constant 0 : index
    %c7_19 = arith.constant 7 : index
    %c0_20 = arith.constant 0 : index
    %22 = vector.load %arg29[%c0_18, %c7_19, %c0_20] : memref<1x32x128xf32, #tpu.memory_space<vmem>>, vector<1x1x32xf32>
    tpu.vector_store %arg29[%c0_18, %c7_19, %c0_20], %21 {strides = array<i32>} : memref<1x32x128xf32, #tpu.memory_space<vmem>>, vector<1x1x32xf32>,
    %c0_21 = arith.constant 0 : index
    %c24_22 = arith.constant 24 : index
    %c0_23 = arith.constant 0 : index
    %23 = vector.load %arg29[%c0_21, %c24_22, %c0_23] : memref<1x32x128xf32, #tpu.memory_space<vmem>>, vector<1x1x32xf32>
    tpu.vector_store %arg29[%c0_21, %c24_22, %c0_23], %21 {strides = array<i32>} : memref<1x32x128xf32, #tpu.memory_space<vmem>>, vector<1x1x32xf32>,
    %c0_24 = arith.constant 0 : index
    %c8_25 = arith.constant 8 : index
    %c0_26 = arith.constant 0 : index
    %24 = vector.load %arg29[%c0_24, %c8_25, %c0_26] : memref<1x32x128xf32, #tpu.memory_space<vmem>>, vector<1x16x32xf32>
    tpu.vector_store %arg29[%c0_24, %c8_25, %c0_26], %20 {strides = array<i32>} : memref<1x32x128xf32, #tpu.memory_space<vmem>>, vector<1x16x32xf32>,
    %c0_27 = arith.constant 0 : index
    %c7_28 = arith.constant 7 : index
    %c0_29 = arith.constant 0 : index
    %25 = vector.load %arg29[%c0_27, %c7_28, %c0_29] : memref<1x32x128xf32, #tpu.memory_space<vmem>>, vector<1x18x32xf32>
    %26 = vector.extract_strided_slice %25 {offsets = [0, 0, 0], sizes = [1, 16, 32], strides = [1, 1, 1]} : vector<1x18x32xf32> to vector<1x16x32xf32>
    %27 = vector.extract_strided_slice %25 {offsets = [0, 1, 0], sizes = [1, 16, 32], strides = [1, 1, 1]} : vector<1x18x32xf32> to vector<1x16x32xf32>
    %28 = vector.extract_strided_slice %25 {offsets = [0, 2, 0], sizes = [1, 16, 32], strides = [1, 1, 1]} : vector<1x18x32xf32> to vector<1x16x32xf32>
    %29 = tpu.concatenate %26, %27, %28 in 2 : vector<1x16x32xf32>, vector<1x16x32xf32>, vector<1x16x32xf32> -> vector<1x16x96xf32>
    %30 = arith.truncf %29 : vector<1x16x96xf32> to vector<1x16x96xbf16>
    %31 = vector.shape_cast %30 : vector<1x16x96xbf16> to vector<16x96xbf16>
    %c0_30 = arith.constant 0 : index
    %c0_31 = arith.constant 0 : index
    %32 = vector.load %arg4[%c0_30, %c0_31] : memref<96x16xbf16, #tpu.memory_space<vmem>>, vector<96x16xbf16>
    %cst_32 = arith.constant dense<0.000000e+00> : vector<16x16xf32>
    %33 = tpu.matmul %31, %32, %cst_32 {dimension_numbers = #tpu.dot_dimension_numbers<[1], [0], [0], [1], [0, 0, 1, 1], [], []>} : vector<16x96xbf16>, vector<96x16xbf16>, vector<16x16xf32> -> vector<16x16xf32>
    %34 = vector.shape_cast %33 : vector<16x16xf32> to vector<1x16x16xf32>
    %c0_33 = arith.constant 0 : index
    %c0_34 = arith.constant 0 : index
    %35 = vector.load %arg5[%c0_33, %c0_34] : memref<1x16xf32, #tpu.memory_space<vmem>>, vector<1x16xf32>
    %36 = vector.shape_cast %35 : vector<1x16xf32> to vector<1x1x16xf32>
    %37 = vector.broadcast %36 : vector<1x1x16xf32> to vector<1x16x16xf32>
    %38 = arith.addf %34, %37 : vector<1x16x16xf32>
    %cst_35 = arith.constant 0.000000e+00 : f32
    %39 = vector.broadcast %cst_35 : f32 to vector<1x16x16xf32>
    %40 = arith.maximumf %38, %39 : vector<1x16x16xf32>
    %cst_36 = arith.constant 0.000000e+00 : f32
    %41 = vector.broadcast %cst_36 : f32 to vector<1x2x16xf32>
    %c0_37 = arith.constant 0 : index
    %c6 = arith.constant 6 : index
    %c0_38 = arith.constant 0 : index
    %42 = vector.load %arg29[%c0_37, %c6, %c0_38] : memref<1x32x128xf32, #tpu.memory_space<vmem>>, vector<1x2x16xf32>
    tpu.vector_store %arg29[%c0_37, %c6, %c0_38], %41 {strides = array<i32>} : memref<1x32x128xf32, #tpu.memory_space<vmem>>, vector<1x2x16xf32>,
    %c0_39 = arith.constant 0 : index
    %c24_40 = arith.constant 24 : index
    %c0_41 = arith.constant 0 : index
    %43 = vector.load %arg29[%c0_39, %c24_40, %c0_41] : memref<1x32x128xf32, #tpu.memory_space<vmem>>, vector<1x2x16xf32>
    tpu.vector_store %arg29[%c0_39, %c24_40, %c0_41], %41 {strides = array<i32>} : memref<1x32x128xf32, #tpu.memory_space<vmem>>, vector<1x2x16xf32>,
    %c0_42 = arith.constant 0 : index
    %c8_43 = arith.constant 8 : index
    %c0_44 = arith.constant 0 : index
    %44 = vector.load %arg29[%c0_42, %c8_43, %c0_44] : memref<1x32x128xf32, #tpu.memory_space<vmem>>, vector<1x16x16xf32>
    tpu.vector_store %arg29[%c0_42, %c8_43, %c0_44], %40 {strides = array<i32>} : memref<1x32x128xf32, #tpu.memory_space<vmem>>, vector<1x16x16xf32>,
    %c0_45 = arith.constant 0 : index
    %c6_46 = arith.constant 6 : index
    %c0_47 = arith.constant 0 : index
    %45 = vector.load %arg29[%c0_45, %c6_46, %c0_47] : memref<1x32x128xf32, #tpu.memory_space<vmem>>, vector<1x20x16xf32>
    %46 = vector.extract_strided_slice %45 {offsets = [0, 0, 0], sizes = [1, 16, 16], strides = [1, 1, 1]} : vector<1x20x16xf32> to vector<1x16x16xf32>
    %47 = vector.extract_strided_slice %45 {offsets = [0, 2, 0], sizes = [1, 16, 16], strides = [1, 1, 1]} : vector<1x20x16xf32> to vector<1x16x16xf32>
    %48 = vector.extract_strided_slice %45 {offsets = [0, 4, 0], sizes = [1, 16, 16], strides = [1, 1, 1]} : vector<1x20x16xf32> to vector<1x16x16xf32>
    %49 = tpu.concatenate %46, %47, %48 in 2 : vector<1x16x16xf32>, vector<1x16x16xf32>, vector<1x16x16xf32> -> vector<1x16x48xf32>
    %50 = arith.truncf %49 : vector<1x16x48xf32> to vector<1x16x48xbf16>
    %51 = vector.shape_cast %50 : vector<1x16x48xbf16> to vector<16x48xbf16>
    %c0_48 = arith.constant 0 : index
    %c0_49 = arith.constant 0 : index
    %52 = vector.load %arg6[%c0_48, %c0_49] : memref<48x16xbf16, #tpu.memory_space<vmem>>, vector<48x16xbf16>
    %cst_50 = arith.constant dense<0.000000e+00> : vector<16x16xf32>
    %53 = tpu.matmul %51, %52, %cst_50 {dimension_numbers = #tpu.dot_dimension_numbers<[1], [0], [0], [1], [0, 0, 1, 1], [], []>} : vector<16x48xbf16>, vector<48x16xbf16>, vector<16x16xf32> -> vector<16x16xf32>
    %54 = vector.shape_cast %53 : vector<16x16xf32> to vector<1x16x16xf32>
    %c0_51 = arith.constant 0 : index
    %c0_52 = arith.constant 0 : index
    %55 = vector.load %arg7[%c0_51, %c0_52] : memref<1x16xf32, #tpu.memory_space<vmem>>, vector<1x16xf32>
    %56 = vector.shape_cast %55 : vector<1x16xf32> to vector<1x1x16xf32>
    %57 = vector.broadcast %56 : vector<1x1x16xf32> to vector<1x16x16xf32>
    %58 = arith.addf %54, %57 : vector<1x16x16xf32>
    %cst_53 = arith.constant 0.000000e+00 : f32
    %59 = vector.broadcast %cst_53 : f32 to vector<1x16x16xf32>
    %60 = arith.maximumf %58, %59 : vector<1x16x16xf32>
    %61 = arith.truncf %60 : vector<1x16x16xf32> to vector<1x16x16xbf16>
    %62 = vector.shape_cast %61 : vector<1x16x16xbf16> to vector<16x16xbf16>
    %c0_54 = arith.constant 0 : index
    %c0_55 = arith.constant 0 : index
    %63 = vector.load %arg8[%c0_54, %c0_55] : memref<16x16xbf16, #tpu.memory_space<vmem>>, vector<16x16xbf16>
    %cst_56 = arith.constant dense<0.000000e+00> : vector<16x16xf32>
    %64 = tpu.matmul %62, %63, %cst_56 {dimension_numbers = #tpu.dot_dimension_numbers<[1], [0], [0], [1], [0, 0, 1, 1], [], []>} : vector<16x16xbf16>, vector<16x16xbf16>, vector<16x16xf32> -> vector<16x16xf32>
    %65 = vector.shape_cast %64 : vector<16x16xf32> to vector<1x16x16xf32>
    %c0_57 = arith.constant 0 : index
    %c0_58 = arith.constant 0 : index
    %66 = vector.load %arg9[%c0_57, %c0_58] : memref<1x16xf32, #tpu.memory_space<vmem>>, vector<1x16xf32>
    %67 = vector.shape_cast %66 : vector<1x16xf32> to vector<1x1x16xf32>
    %68 = vector.broadcast %67 : vector<1x1x16xf32> to vector<1x16x16xf32>
    %69 = arith.addf %65, %68 : vector<1x16x16xf32>
    %70 = arith.addf %69, %38 : vector<1x16x16xf32>
    %cst_59 = arith.constant 0.000000e+00 : f32
    %71 = vector.broadcast %cst_59 : f32 to vector<1x16x16xf32>
    %72 = arith.maximumf %70, %71 : vector<1x16x16xf32>
    %cst_60 = arith.constant 0.000000e+00 : f32
    %73 = vector.broadcast %cst_60 : f32 to vector<1x1x16xf32>
    %c0_61 = arith.constant 0 : index
    %c7_62 = arith.constant 7 : index
    %c0_63 = arith.constant 0 : index
    %74 = vector.load %arg29[%c0_61, %c7_62, %c0_63] : memref<1x32x128xf32, #tpu.memory_space<vmem>>, vector<1x1x16xf32>
    tpu.vector_store %arg29[%c0_61, %c7_62, %c0_63], %73 {strides = array<i32>} : memref<1x32x128xf32, #tpu.memory_space<vmem>>, vector<1x1x16xf32>,
    %c0_64 = arith.constant 0 : index
    %c24_65 = arith.constant 24 : index
    %c0_66 = arith.constant 0 : index
    %75 = vector.load %arg29[%c0_64, %c24_65, %c0_66] : memref<1x32x128xf32, #tpu.memory_space<vmem>>, vector<1x1x16xf32>
    tpu.vector_store %arg29[%c0_64, %c24_65, %c0_66], %73 {strides = array<i32>} : memref<1x32x128xf32, #tpu.memory_space<vmem>>, vector<1x1x16xf32>,
    %c0_67 = arith.constant 0 : index
    %c8_68 = arith.constant 8 : index
    %c0_69 = arith.constant 0 : index
    %76 = vector.load %arg29[%c0_67, %c8_68, %c0_69] : memref<1x32x128xf32, #tpu.memory_space<vmem>>, vector<1x16x16xf32>
    tpu.vector_store %arg29[%c0_67, %c8_68, %c0_69], %72 {strides = array<i32>} : memref<1x32x128xf32, #tpu.memory_space<vmem>>, vector<1x16x16xf32>,
    %c0_70 = arith.constant 0 : index
    %c7_71 = arith.constant 7 : index
    %c0_72 = arith.constant 0 : index
    %77 = vector.load %arg29[%c0_70, %c7_71, %c0_72] : memref<1x32x128xf32, #tpu.memory_space<vmem>>, vector<1x18x16xf32>
    %78 = vector.extract_strided_slice %77 {offsets = [0, 0, 0], sizes = [1, 16, 16], strides = [1, 1, 1]} : vector<1x18x16xf32> to vector<1x16x16xf32>
    %79 = vector.extract_strided_slice %77 {offsets = [0, 1, 0], sizes = [1, 16, 16], strides = [1, 1, 1]} : vector<1x18x16xf32> to vector<1x16x16xf32>
    %80 = vector.extract_strided_slice %77 {offsets = [0, 2, 0], sizes = [1, 16, 16], strides = [1, 1, 1]} : vector<1x18x16xf32> to vector<1x16x16xf32>
    %81 = tpu.concatenate %78, %79, %80 in 2 : vector<1x16x16xf32>, vector<1x16x16xf32>, vector<1x16x16xf32> -> vector<1x16x48xf32>
    %82 = arith.truncf %81 : vector<1x16x48xf32> to vector<1x16x48xbf16>
    %83 = vector.shape_cast %82 : vector<1x16x48xbf16> to vector<16x48xbf16>
    %c0_73 = arith.constant 0 : index
    %c0_74 = arith.constant 0 : index
    %84 = vector.load %arg10[%c0_73, %c0_74] : memref<48x16xbf16, #tpu.memory_space<vmem>>, vector<48x16xbf16>
    %cst_75 = arith.constant dense<0.000000e+00> : vector<16x16xf32>
    %85 = tpu.matmul %83, %84, %cst_75 {dimension_numbers = #tpu.dot_dimension_numbers<[1], [0], [0], [1], [0, 0, 1, 1], [], []>} : vector<16x48xbf16>, vector<48x16xbf16>, vector<16x16xf32> -> vector<16x16xf32>
    %86 = vector.shape_cast %85 : vector<16x16xf32> to vector<1x16x16xf32>
    %c0_76 = arith.constant 0 : index
    %c0_77 = arith.constant 0 : index
    %87 = vector.load %arg11[%c0_76, %c0_77] : memref<1x16xf32, #tpu.memory_space<vmem>>, vector<1x16xf32>
    %88 = vector.shape_cast %87 : vector<1x16xf32> to vector<1x1x16xf32>
    %89 = vector.broadcast %88 : vector<1x1x16xf32> to vector<1x16x16xf32>
    %90 = arith.addf %86, %89 : vector<1x16x16xf32>
    %cst_78 = arith.constant 0.000000e+00 : f32
    %91 = vector.broadcast %cst_78 : f32 to vector<1x16x16xf32>
    %92 = arith.maximumf %90, %91 : vector<1x16x16xf32>
    %93 = arith.truncf %92 : vector<1x16x16xf32> to vector<1x16x16xbf16>
    %94 = vector.shape_cast %93 : vector<1x16x16xbf16> to vector<16x16xbf16>
    %c0_79 = arith.constant 0 : index
    %c0_80 = arith.constant 0 : index
    %95 = vector.load %arg12[%c0_79, %c0_80] : memref<16x16xbf16, #tpu.memory_space<vmem>>, vector<16x16xbf16>
    %cst_81 = arith.constant dense<0.000000e+00> : vector<16x16xf32>
    %96 = tpu.matmul %94, %95, %cst_81 {dimension_numbers = #tpu.dot_dimension_numbers<[1], [0], [0], [1], [0, 0, 1, 1], [], []>} : vector<16x16xbf16>, vector<16x16xbf16>, vector<16x16xf32> -> vector<16x16xf32>
    %97 = vector.shape_cast %96 : vector<16x16xf32> to vector<1x16x16xf32>
    %c0_82 = arith.constant 0 : index
    %c0_83 = arith.constant 0 : index
    %98 = vector.load %arg13[%c0_82, %c0_83] : memref<1x16xf32, #tpu.memory_space<vmem>>, vector<1x16xf32>
    %99 = vector.shape_cast %98 : vector<1x16xf32> to vector<1x1x16xf32>
    %100 = vector.broadcast %99 : vector<1x1x16xf32> to vector<1x16x16xf32>
    %101 = arith.addf %97, %100 : vector<1x16x16xf32>
    %102 = arith.addf %101, %70 : vector<1x16x16xf32>
    %cst_84 = arith.constant 0.000000e+00 : f32
    %103 = vector.broadcast %cst_84 : f32 to vector<1x1x16xf32>
    %c0_85 = arith.constant 0 : index
    %c7_86 = arith.constant 7 : index
    %c0_87 = arith.constant 0 : index
    %104 = vector.load %arg29[%c0_85, %c7_86, %c0_87] : memref<1x32x128xf32, #tpu.memory_space<vmem>>, vector<1x1x16xf32>
    tpu.vector_store %arg29[%c0_85, %c7_86, %c0_87], %103 {strides = array<i32>} : memref<1x32x128xf32, #tpu.memory_space<vmem>>, vector<1x1x16xf32>,
    %c0_88 = arith.constant 0 : index
    %c24_89 = arith.constant 24 : index
    %c0_90 = arith.constant 0 : index
    %105 = vector.load %arg29[%c0_88, %c24_89, %c0_90] : memref<1x32x128xf32, #tpu.memory_space<vmem>>, vector<1x1x16xf32>
    tpu.vector_store %arg29[%c0_88, %c24_89, %c0_90], %103 {strides = array<i32>} : memref<1x32x128xf32, #tpu.memory_space<vmem>>, vector<1x1x16xf32>,
    %c0_91 = arith.constant 0 : index
    %c8_92 = arith.constant 8 : index
    %c0_93 = arith.constant 0 : index
    %106 = vector.load %arg29[%c0_91, %c8_92, %c0_93] : memref<1x32x128xf32, #tpu.memory_space<vmem>>, vector<1x16x16xf32>
    tpu.vector_store %arg29[%c0_91, %c8_92, %c0_93], %102 {strides = array<i32>} : memref<1x32x128xf32, #tpu.memory_space<vmem>>, vector<1x16x16xf32>,
    %c0_94 = arith.constant 0 : index
    %c7_95 = arith.constant 7 : index
    %c0_96 = arith.constant 0 : index
    %107 = vector.load %arg29[%c0_94, %c7_95, %c0_96] : memref<1x32x128xf32, #tpu.memory_space<vmem>>, vector<1x18x16xf32>
    %108 = vector.extract_strided_slice %107 {offsets = [0, 0, 0], sizes = [1, 16, 16], strides = [1, 1, 1]} : vector<1x18x16xf32> to vector<1x16x16xf32>
    %109 = vector.extract_strided_slice %107 {offsets = [0, 1, 0], sizes = [1, 16, 16], strides = [1, 1, 1]} : vector<1x18x16xf32> to vector<1x16x16xf32>
    %110 = vector.extract_strided_slice %107 {offsets = [0, 2, 0], sizes = [1, 16, 16], strides = [1, 1, 1]} : vector<1x18x16xf32> to vector<1x16x16xf32>
    %111 = tpu.concatenate %108, %109, %110 in 2 : vector<1x16x16xf32>, vector<1x16x16xf32>, vector<1x16x16xf32> -> vector<1x16x48xf32>
    %112 = arith.truncf %111 : vector<1x16x48xf32> to vector<1x16x48xbf16>
    %113 = vector.shape_cast %112 : vector<1x16x48xbf16> to vector<16x48xbf16>
    %c0_97 = arith.constant 0 : index
    %c0_98 = arith.constant 0 : index
    %114 = vector.load %arg14[%c0_97, %c0_98] : memref<48x8xbf16, #tpu.memory_space<vmem>>, vector<48x8xbf16>
    %cst_99 = arith.constant dense<0.000000e+00> : vector<16x8xf32>
    %115 = tpu.matmul %113, %114, %cst_99 {dimension_numbers = #tpu.dot_dimension_numbers<[1], [0], [0], [1], [0, 0, 1, 1], [], []>} : vector<16x48xbf16>, vector<48x8xbf16>, vector<16x8xf32> -> vector<16x8xf32>
    %116 = vector.shape_cast %115 : vector<16x8xf32> to vector<1x16x8xf32>
    %c0_100 = arith.constant 0 : index
    %c0_101 = arith.constant 0 : index
    %117 = vector.load %arg15[%c0_100, %c0_101] : memref<1x8xf32, #tpu.memory_space<vmem>>, vector<1x8xf32>
    %118 = vector.shape_cast %117 : vector<1x8xf32> to vector<1x1x8xf32>
    %119 = vector.broadcast %118 : vector<1x1x8xf32> to vector<1x16x8xf32>
    %120 = arith.addf %116, %119 : vector<1x16x8xf32>
    %cst_102 = arith.constant 0.000000e+00 : f32
    %121 = vector.broadcast %cst_102 : f32 to vector<1x16x8xf32>
    %122 = arith.maximumf %120, %121 : vector<1x16x8xf32>
    %cst_103 = arith.constant 0.000000e+00 : f32
    %123 = vector.broadcast %cst_103 : f32 to vector<1x2x8xf32>
    %c0_104 = arith.constant 0 : index
    %c6_105 = arith.constant 6 : index
    %c0_106 = arith.constant 0 : index
    %124 = vector.load %arg29[%c0_104, %c6_105, %c0_106] : memref<1x32x128xf32, #tpu.memory_space<vmem>>, vector<1x2x8xf32>
    tpu.vector_store %arg29[%c0_104, %c6_105, %c0_106], %123 {strides = array<i32>} : memref<1x32x128xf32, #tpu.memory_space<vmem>>, vector<1x2x8xf32>,
    %c0_107 = arith.constant 0 : index
    %c24_108 = arith.constant 24 : index
    %c0_109 = arith.constant 0 : index
    %125 = vector.load %arg29[%c0_107, %c24_108, %c0_109] : memref<1x32x128xf32, #tpu.memory_space<vmem>>, vector<1x2x8xf32>
    tpu.vector_store %arg29[%c0_107, %c24_108, %c0_109], %123 {strides = array<i32>} : memref<1x32x128xf32, #tpu.memory_space<vmem>>, vector<1x2x8xf32>,
    %c0_110 = arith.constant 0 : index
    %c8_111 = arith.constant 8 : index
    %c0_112 = arith.constant 0 : index
    %126 = vector.load %arg29[%c0_110, %c8_111, %c0_112] : memref<1x32x128xf32, #tpu.memory_space<vmem>>, vector<1x16x8xf32>
    tpu.vector_store %arg29[%c0_110, %c8_111, %c0_112], %122 {strides = array<i32>} : memref<1x32x128xf32, #tpu.memory_space<vmem>>, vector<1x16x8xf32>,
    %c0_113 = arith.constant 0 : index
    %c6_114 = arith.constant 6 : index
    %c0_115 = arith.constant 0 : index
    %127 = vector.load %arg29[%c0_113, %c6_114, %c0_115] : memref<1x32x128xf32, #tpu.memory_space<vmem>>, vector<1x20x8xf32>
    %128 = vector.extract_strided_slice %127 {offsets = [0, 0, 0], sizes = [1, 16, 8], strides = [1, 1, 1]} : vector<1x20x8xf32> to vector<1x16x8xf32>
    %129 = vector.extract_strided_slice %127 {offsets = [0, 2, 0], sizes = [1, 16, 8], strides = [1, 1, 1]} : vector<1x20x8xf32> to vector<1x16x8xf32>
    %130 = vector.extract_strided_slice %127 {offsets = [0, 4, 0], sizes = [1, 16, 8], strides = [1, 1, 1]} : vector<1x20x8xf32> to vector<1x16x8xf32>
    %131 = tpu.concatenate %128, %129, %130 in 2 : vector<1x16x8xf32>, vector<1x16x8xf32>, vector<1x16x8xf32> -> vector<1x16x24xf32>
    %132 = arith.truncf %131 : vector<1x16x24xf32> to vector<1x16x24xbf16>
    %133 = vector.shape_cast %132 : vector<1x16x24xbf16> to vector<16x24xbf16>
    %c0_116 = arith.constant 0 : index
    %c0_117 = arith.constant 0 : index
    %134 = vector.load %arg16[%c0_116, %c0_117] : memref<24x8xbf16, #tpu.memory_space<vmem>>, vector<24x8xbf16>
    %cst_118 = arith.constant dense<0.000000e+00> : vector<16x8xf32>
    %135 = tpu.matmul %133, %134, %cst_118 {dimension_numbers = #tpu.dot_dimension_numbers<[1], [0], [0], [1], [0, 0, 1, 1], [], []>} : vector<16x24xbf16>, vector<24x8xbf16>, vector<16x8xf32> -> vector<16x8xf32>
    %136 = vector.shape_cast %135 : vector<16x8xf32> to vector<1x16x8xf32>
    %c0_119 = arith.constant 0 : index
    %c0_120 = arith.constant 0 : index
    %137 = vector.load %arg17[%c0_119, %c0_120] : memref<1x8xf32, #tpu.memory_space<vmem>>, vector<1x8xf32>
    %138 = vector.shape_cast %137 : vector<1x8xf32> to vector<1x1x8xf32>
    %139 = vector.broadcast %138 : vector<1x1x8xf32> to vector<1x16x8xf32>
    %140 = arith.addf %136, %139 : vector<1x16x8xf32>
    %cst_121 = arith.constant 0.000000e+00 : f32
    %141 = vector.broadcast %cst_121 : f32 to vector<1x16x8xf32>
    %142 = arith.maximumf %140, %141 : vector<1x16x8xf32>
    %143 = arith.truncf %142 : vector<1x16x8xf32> to vector<1x16x8xbf16>
    %144 = vector.shape_cast %143 : vector<1x16x8xbf16> to vector<16x8xbf16>
    %c0_122 = arith.constant 0 : index
    %c0_123 = arith.constant 0 : index
    %145 = vector.load %arg18[%c0_122, %c0_123] : memref<8x8xbf16, #tpu.memory_space<vmem>>, vector<8x8xbf16>
    %cst_124 = arith.constant dense<0.000000e+00> : vector<16x8xf32>
    %146 = tpu.matmul %144, %145, %cst_124 {dimension_numbers = #tpu.dot_dimension_numbers<[1], [0], [0], [1], [0, 0, 1, 1], [], []>} : vector<16x8xbf16>, vector<8x8xbf16>, vector<16x8xf32> -> vector<16x8xf32>
    %147 = vector.shape_cast %146 : vector<16x8xf32> to vector<1x16x8xf32>
    %c0_125 = arith.constant 0 : index
    %c0_126 = arith.constant 0 : index
    %148 = vector.load %arg19[%c0_125, %c0_126] : memref<1x8xf32, #tpu.memory_space<vmem>>, vector<1x8xf32>
    %149 = vector.shape_cast %148 : vector<1x8xf32> to vector<1x1x8xf32>
    %150 = vector.broadcast %149 : vector<1x1x8xf32> to vector<1x16x8xf32>
    %151 = arith.addf %147, %150 : vector<1x16x8xf32>
    %152 = arith.addf %151, %120 : vector<1x16x8xf32>
    %cst_127 = arith.constant 0.000000e+00 : f32
    %153 = vector.broadcast %cst_127 : f32 to vector<1x16x8xf32>
    %154 = arith.maximumf %152, %153 : vector<1x16x8xf32>
    %cst_128 = arith.constant 0.000000e+00 : f32
    %155 = vector.broadcast %cst_128 : f32 to vector<1x1x8xf32>
    %c0_129 = arith.constant 0 : index
    %c7_130 = arith.constant 7 : index
    %c0_131 = arith.constant 0 : index
    %156 = vector.load %arg29[%c0_129, %c7_130, %c0_131] : memref<1x32x128xf32, #tpu.memory_space<vmem>>, vector<1x1x8xf32>
    tpu.vector_store %arg29[%c0_129, %c7_130, %c0_131], %155 {strides = array<i32>} : memref<1x32x128xf32, #tpu.memory_space<vmem>>, vector<1x1x8xf32>,
    %c0_132 = arith.constant 0 : index
    %c24_133 = arith.constant 24 : index
    %c0_134 = arith.constant 0 : index
    %157 = vector.load %arg29[%c0_132, %c24_133, %c0_134] : memref<1x32x128xf32, #tpu.memory_space<vmem>>, vector<1x1x8xf32>
    tpu.vector_store %arg29[%c0_132, %c24_133, %c0_134], %155 {strides = array<i32>} : memref<1x32x128xf32, #tpu.memory_space<vmem>>, vector<1x1x8xf32>,
    %c0_135 = arith.constant 0 : index
    %c8_136 = arith.constant 8 : index
    %c0_137 = arith.constant 0 : index
    %158 = vector.load %arg29[%c0_135, %c8_136, %c0_137] : memref<1x32x128xf32, #tpu.memory_space<vmem>>, vector<1x16x8xf32>
    tpu.vector_store %arg29[%c0_135, %c8_136, %c0_137], %154 {strides = array<i32>} : memref<1x32x128xf32, #tpu.memory_space<vmem>>, vector<1x16x8xf32>,
    %c0_138 = arith.constant 0 : index
    %c7_139 = arith.constant 7 : index
    %c0_140 = arith.constant 0 : index
    %159 = vector.load %arg29[%c0_138, %c7_139, %c0_140] : memref<1x32x128xf32, #tpu.memory_space<vmem>>, vector<1x18x8xf32>
    %160 = vector.extract_strided_slice %159 {offsets = [0, 0, 0], sizes = [1, 16, 8], strides = [1, 1, 1]} : vector<1x18x8xf32> to vector<1x16x8xf32>
    %161 = vector.extract_strided_slice %159 {offsets = [0, 1, 0], sizes = [1, 16, 8], strides = [1, 1, 1]} : vector<1x18x8xf32> to vector<1x16x8xf32>
    %162 = vector.extract_strided_slice %159 {offsets = [0, 2, 0], sizes = [1, 16, 8], strides = [1, 1, 1]} : vector<1x18x8xf32> to vector<1x16x8xf32>
    %163 = tpu.concatenate %160, %161, %162 in 2 : vector<1x16x8xf32>, vector<1x16x8xf32>, vector<1x16x8xf32> -> vector<1x16x24xf32>
    %164 = arith.truncf %163 : vector<1x16x24xf32> to vector<1x16x24xbf16>
    %165 = vector.shape_cast %164 : vector<1x16x24xbf16> to vector<16x24xbf16>
    %c0_141 = arith.constant 0 : index
    %c0_142 = arith.constant 0 : index
    %166 = vector.load %arg20[%c0_141, %c0_142] : memref<24x8xbf16, #tpu.memory_space<vmem>>, vector<24x8xbf16>
    %cst_143 = arith.constant dense<0.000000e+00> : vector<16x8xf32>
    %167 = tpu.matmul %165, %166, %cst_143 {dimension_numbers = #tpu.dot_dimension_numbers<[1], [0], [0], [1], [0, 0, 1, 1], [], []>} : vector<16x24xbf16>, vector<24x8xbf16>, vector<16x8xf32> -> vector<16x8xf32>
    %168 = vector.shape_cast %167 : vector<16x8xf32> to vector<1x16x8xf32>
    %c0_144 = arith.constant 0 : index
    %c0_145 = arith.constant 0 : index
    %169 = vector.load %arg21[%c0_144, %c0_145] : memref<1x8xf32, #tpu.memory_space<vmem>>, vector<1x8xf32>
    %170 = vector.shape_cast %169 : vector<1x8xf32> to vector<1x1x8xf32>
    %171 = vector.broadcast %170 : vector<1x1x8xf32> to vector<1x16x8xf32>
    %172 = arith.addf %168, %171 : vector<1x16x8xf32>
    %cst_146 = arith.constant 0.000000e+00 : f32
    %173 = vector.broadcast %cst_146 : f32 to vector<1x16x8xf32>
    %174 = arith.maximumf %172, %173 : vector<1x16x8xf32>
    %175 = arith.truncf %174 : vector<1x16x8xf32> to vector<1x16x8xbf16>
    %176 = vector.shape_cast %175 : vector<1x16x8xbf16> to vector<16x8xbf16>
    %c0_147 = arith.constant 0 : index
    %c0_148 = arith.constant 0 : index
    %177 = vector.load %arg22[%c0_147, %c0_148] : memref<8x8xbf16, #tpu.memory_space<vmem>>, vector<8x8xbf16>
    %cst_149 = arith.constant dense<0.000000e+00> : vector<16x8xf32>
    %178 = tpu.matmul %176, %177, %cst_149 {dimension_numbers = #tpu.dot_dimension_numbers<[1], [0], [0], [1], [0, 0, 1, 1], [], []>} : vector<16x8xbf16>, vector<8x8xbf16>, vector<16x8xf32> -> vector<16x8xf32>
    %179 = vector.shape_cast %178 : vector<16x8xf32> to vector<1x16x8xf32>
    %c0_150 = arith.constant 0 : index
    %c0_151 = arith.constant 0 : index
    %180 = vector.load %arg23[%c0_150, %c0_151] : memref<1x8xf32, #tpu.memory_space<vmem>>, vector<1x8xf32>
    %181 = vector.shape_cast %180 : vector<1x8xf32> to vector<1x1x8xf32>
    %182 = vector.broadcast %181 : vector<1x1x8xf32> to vector<1x16x8xf32>
    %183 = arith.addf %179, %182 : vector<1x16x8xf32>
    %184 = arith.addf %183, %152 : vector<1x16x8xf32>
    %cst_152 = arith.constant 0.000000e+00 : f32
    %185 = vector.broadcast %cst_152 : f32 to vector<1x1x8xf32>
    %c0_153 = arith.constant 0 : index
    %c7_154 = arith.constant 7 : index
    %c0_155 = arith.constant 0 : index
    %186 = vector.load %arg29[%c0_153, %c7_154, %c0_155] : memref<1x32x128xf32, #tpu.memory_space<vmem>>, vector<1x1x8xf32>
    tpu.vector_store %arg29[%c0_153, %c7_154, %c0_155], %185 {strides = array<i32>} : memref<1x32x128xf32, #tpu.memory_space<vmem>>, vector<1x1x8xf32>,
    %c0_156 = arith.constant 0 : index
    %c24_157 = arith.constant 24 : index
    %c0_158 = arith.constant 0 : index
    %187 = vector.load %arg29[%c0_156, %c24_157, %c0_158] : memref<1x32x128xf32, #tpu.memory_space<vmem>>, vector<1x1x8xf32>
    tpu.vector_store %arg29[%c0_156, %c24_157, %c0_158], %185 {strides = array<i32>} : memref<1x32x128xf32, #tpu.memory_space<vmem>>, vector<1x1x8xf32>,
    %c0_159 = arith.constant 0 : index
    %c8_160 = arith.constant 8 : index
    %c0_161 = arith.constant 0 : index
    %188 = vector.load %arg29[%c0_159, %c8_160, %c0_161] : memref<1x32x128xf32, #tpu.memory_space<vmem>>, vector<1x16x8xf32>
    tpu.vector_store %arg29[%c0_159, %c8_160, %c0_161], %184 {strides = array<i32>} : memref<1x32x128xf32, #tpu.memory_space<vmem>>, vector<1x16x8xf32>,
    %c0_162 = arith.constant 0 : index
    %c7_163 = arith.constant 7 : index
    %c0_164 = arith.constant 0 : index
    %189 = tpu.strided_load %arg29[%c0_162, %c7_163, %c0_164] {strides = array<i32: 1, 2, 1>} : memref<1x32x128xf32, #tpu.memory_space<vmem>>, vector<1x8x128xf32>
    %190 = vector.extract_strided_slice %189 {offsets = [0, 0, 0], sizes = [1, 8, 8], strides = [1, 1, 1]} : vector<1x8x128xf32> to vector<1x8x8xf32>
    %c0_165 = arith.constant 0 : index
    %c8_166 = arith.constant 8 : index
    %c0_167 = arith.constant 0 : index
    %191 = tpu.strided_load %arg29[%c0_165, %c8_166, %c0_167] {strides = array<i32: 1, 2, 1>} : memref<1x32x128xf32, #tpu.memory_space<vmem>>, vector<1x8x128xf32>
    %192 = vector.extract_strided_slice %191 {offsets = [0, 0, 0], sizes = [1, 8, 8], strides = [1, 1, 1]} : vector<1x8x128xf32> to vector<1x8x8xf32>
    %c0_168 = arith.constant 0 : index
    %c9 = arith.constant 9 : index
    %c0_169 = arith.constant 0 : index
    %193 = tpu.strided_load %arg29[%c0_168, %c9, %c0_169] {strides = array<i32: 1, 2, 1>} : memref<1x32x128xf32, #tpu.memory_space<vmem>>, vector<1x8x128xf32>
    %194 = vector.extract_strided_slice %193 {offsets = [0, 0, 0], sizes = [1, 8, 8], strides = [1, 1, 1]} : vector<1x8x128xf32> to vector<1x8x8xf32>
    %c0_170 = arith.constant 0 : index
    %c10 = arith.constant 10 : index
    %c0_171 = arith.constant 0 : index
    %195 = tpu.strided_load %arg29[%c0_170, %c10, %c0_171] {strides = array<i32: 1, 2, 1>} : memref<1x32x128xf32, #tpu.memory_space<vmem>>, vector<1x8x128xf32>
    %196 = vector.extract_strided_slice %195 {offsets = [0, 0, 0], sizes = [1, 8, 8], strides = [1, 1, 1]} : vector<1x8x128xf32> to vector<1x8x8xf32>
    %197 = tpu.concatenate %190, %192, %194, %196 in 2 : vector<1x8x8xf32>, vector<1x8x8xf32>, vector<1x8x8xf32>, vector<1x8x8xf32> -> vector<1x8x32xf32>
    %198 = arith.truncf %197 : vector<1x8x32xf32> to vector<1x8x32xbf16>
    %199 = vector.shape_cast %198 : vector<1x8x32xbf16> to vector<8x32xbf16>
    %c0_172 = arith.constant 0 : index
    %c0_173 = arith.constant 0 : index
    %200 = vector.load %arg24[%c0_172, %c0_173] : memref<32x8xbf16, #tpu.memory_space<vmem>>, vector<32x8xbf16>
    %cst_174 = arith.constant dense<0.000000e+00> : vector<8x8xf32>
    %201 = tpu.matmul %199, %200, %cst_174 {dimension_numbers = #tpu.dot_dimension_numbers<[1], [0], [0], [1], [0, 0, 1, 1], [], []>} : vector<8x32xbf16>, vector<32x8xbf16>, vector<8x8xf32> -> vector<8x8xf32>
    %202 = vector.shape_cast %201 : vector<8x8xf32> to vector<1x8x8xf32>
    %c0_175 = arith.constant 0 : index
    %c0_176 = arith.constant 0 : index
    %203 = vector.load %arg25[%c0_175, %c0_176] : memref<1x8xf32, #tpu.memory_space<vmem>>, vector<1x8xf32>
    %204 = vector.shape_cast %203 : vector<1x8xf32> to vector<1x1x8xf32>
    %205 = vector.broadcast %204 : vector<1x1x8xf32> to vector<1x8x8xf32>
    %206 = arith.addf %202, %205 : vector<1x8x8xf32>
    %cst_177 = arith.constant 0.000000e+00 : f32
    %207 = vector.broadcast %cst_177 : f32 to vector<1x1x8xf32>
    %c0_178 = arith.constant 0 : index
    %c7_179 = arith.constant 7 : index
    %c0_180 = arith.constant 0 : index
    %208 = vector.load %arg29[%c0_178, %c7_179, %c0_180] : memref<1x32x128xf32, #tpu.memory_space<vmem>>, vector<1x1x8xf32>
    tpu.vector_store %arg29[%c0_178, %c7_179, %c0_180], %207 {strides = array<i32>} : memref<1x32x128xf32, #tpu.memory_space<vmem>>, vector<1x1x8xf32>,
    %c0_181 = arith.constant 0 : index
    %c16 = arith.constant 16 : index
    %c0_182 = arith.constant 0 : index
    %209 = vector.load %arg29[%c0_181, %c16, %c0_182] : memref<1x32x128xf32, #tpu.memory_space<vmem>>, vector<1x1x8xf32>
    tpu.vector_store %arg29[%c0_181, %c16, %c0_182], %207 {strides = array<i32>} : memref<1x32x128xf32, #tpu.memory_space<vmem>>, vector<1x1x8xf32>,
    %c0_183 = arith.constant 0 : index
    %c8_184 = arith.constant 8 : index
    %c0_185 = arith.constant 0 : index
    %210 = vector.load %arg29[%c0_183, %c8_184, %c0_185] : memref<1x32x128xf32, #tpu.memory_space<vmem>>, vector<1x8x8xf32>
    tpu.vector_store %arg29[%c0_183, %c8_184, %c0_185], %206 {strides = array<i32>} : memref<1x32x128xf32, #tpu.memory_space<vmem>>, vector<1x8x8xf32>,
    %c0_186 = arith.constant 0 : index
    %c7_187 = arith.constant 7 : index
    %c0_188 = arith.constant 0 : index
    %211 = vector.load %arg29[%c0_186, %c7_187, %c0_188] : memref<1x32x128xf32, #tpu.memory_space<vmem>>, vector<1x10x8xf32>
    %212 = vector.extract_strided_slice %211 {offsets = [0, 0, 0], sizes = [1, 8, 8], strides = [1, 1, 1]} : vector<1x10x8xf32> to vector<1x8x8xf32>
    %213 = vector.extract_strided_slice %211 {offsets = [0, 1, 0], sizes = [1, 8, 8], strides = [1, 1, 1]} : vector<1x10x8xf32> to vector<1x8x8xf32>
    %214 = vector.extract_strided_slice %211 {offsets = [0, 2, 0], sizes = [1, 8, 8], strides = [1, 1, 1]} : vector<1x10x8xf32> to vector<1x8x8xf32>
    %215 = tpu.concatenate %212, %213, %214 in 2 : vector<1x8x8xf32>, vector<1x8x8xf32>, vector<1x8x8xf32> -> vector<1x8x24xf32>
    %216 = arith.truncf %215 : vector<1x8x24xf32> to vector<1x8x24xbf16>
    %217 = vector.shape_cast %216 : vector<1x8x24xbf16> to vector<8x24xbf16>
    %c0_189 = arith.constant 0 : index
    %c0_190 = arith.constant 0 : index
    %218 = vector.load %arg26[%c0_189, %c0_190] : memref<24x4xbf16, #tpu.memory_space<vmem>>, vector<24x4xbf16>
    %cst_191 = arith.constant dense<0.000000e+00> : vector<8x4xf32>
    %219 = tpu.matmul %217, %218, %cst_191 {dimension_numbers = #tpu.dot_dimension_numbers<[1], [0], [0], [1], [0, 0, 1, 1], [], []>} : vector<8x24xbf16>, vector<24x4xbf16>, vector<8x4xf32> -> vector<8x4xf32>
    %220 = vector.shape_cast %219 : vector<8x4xf32> to vector<1x8x4xf32>
    %c0_192 = arith.constant 0 : index
    %c0_193 = arith.constant 0 : index
    %221 = vector.load %arg27[%c0_192, %c0_193] : memref<1x4xf32, #tpu.memory_space<vmem>>, vector<1x4xf32>
    %222 = vector.shape_cast %221 : vector<1x4xf32> to vector<1x1x4xf32>
    %223 = vector.broadcast %222 : vector<1x1x4xf32> to vector<1x8x4xf32>
    %224 = arith.addf %220, %223 : vector<1x8x4xf32>
    %c0_194 = arith.constant 0 : index
    %c0_195 = arith.constant 0 : index
    %c0_196 = arith.constant 0 : index
    %225 = vector.load %arg28[%c0_194, %c0_195, %c0_196] : memref<1x8x4xf32, #tpu.memory_space<vmem>>, vector<1x8x4xf32>
    tpu.vector_store %arg28[%c0_194, %c0_195, %c0_196], %224 {strides = array<i32>} : memref<1x8x4xf32, #tpu.memory_space<vmem>>, vector<1x8x4xf32>,
    return
  }
  func.func @transform_0(%arg0: i32) -> (i32, i32, i32) {
    %c0_i32 = arith.constant 0 : i32
    %c0_i32_0 = arith.constant 0 : i32
    %c0_i32_1 = arith.constant 0 : i32
    return %arg0, %c0_i32, %c0_i32_0 : i32, i32, i32
  }
  func.func @transform_1(%arg0: i32) -> (i32, i32) {
    %c0_i32 = arith.constant 0 : i32
    %c0_i32_0 = arith.constant 0 : i32
    %c0_i32_1 = arith.constant 0 : i32
    return %c0_i32, %c0_i32_0 : i32, i32
  }
  func.func @transform_2(%arg0: i32) -> (i32, i32) {
    %c0_i32 = arith.constant 0 : i32
    %c0_i32_0 = arith.constant 0 : i32
    %c0_i32_1 = arith.constant 0 : i32
    return %c0_i32, %c0_i32_0 : i32, i32
  }
  func.func @transform_3(%arg0: i32) -> (i32, i32) {
    %c0_i32 = arith.constant 0 : i32
    %c0_i32_0 = arith.constant 0 : i32
    %c0_i32_1 = arith.constant 0 : i32
    return %c0_i32, %c0_i32_0 : i32, i32
  }
  func.func @transform_4(%arg0: i32) -> (i32, i32) {
    %c0_i32 = arith.constant 0 : i32
    %c0_i32_0 = arith.constant 0 : i32
    %c0_i32_1 = arith.constant 0 : i32
    return %c0_i32, %c0_i32_0 : i32, i32
  }
  func.func @transform_5(%arg0: i32) -> (i32, i32) {
    %c0_i32 = arith.constant 0 : i32
    %c0_i32_0 = arith.constant 0 : i32
    %c0_i32_1 = arith.constant 0 : i32
    return %c0_i32, %c0_i32_0 : i32, i32
  }
  func.func @transform_6(%arg0: i32) -> (i32, i32) {
    %c0_i32 = arith.constant 0 : i32
    %c0_i32_0 = arith.constant 0 : i32
    %c0_i32_1 = arith.constant 0 : i32
    return %c0_i32, %c0_i32_0 : i32, i32
  }
  func.func @transform_7(%arg0: i32) -> (i32, i32) {
    %c0_i32 = arith.constant 0 : i32
    %c0_i32_0 = arith.constant 0 : i32
    %c0_i32_1 = arith.constant 0 : i32
    return %c0_i32, %c0_i32_0 : i32, i32
  }
  func.func @transform_8(%arg0: i32) -> (i32, i32) {
    %c0_i32 = arith.constant 0 : i32
    %c0_i32_0 = arith.constant 0 : i32
    %c0_i32_1 = arith.constant 0 : i32
    return %c0_i32, %c0_i32_0 : i32, i32
  }
  func.func @transform_9(%arg0: i32) -> (i32, i32) {
    %c0_i32 = arith.constant 0 : i32
    %c0_i32_0 = arith.constant 0 : i32
    %c0_i32_1 = arith.constant 0 : i32
    return %c0_i32, %c0_i32_0 : i32, i32
  }
  func.func @transform_10(%arg0: i32) -> (i32, i32) {
    %c0_i32 = arith.constant 0 : i32
    %c0_i32_0 = arith.constant 0 : i32
    %c0_i32_1 = arith.constant 0 : i32
    return %c0_i32, %c0_i32_0 : i32, i32
  }
  func.func @transform_11(%arg0: i32) -> (i32, i32) {
    %c0_i32 = arith.constant 0 : i32
    %c0_i32_0 = arith.constant 0 : i32
    %c0_i32_1 = arith.constant 0 : i32
    return %c0_i32, %c0_i32_0 : i32, i32
  }
  func.func @transform_12(%arg0: i32) -> (i32, i32) {
    %c0_i32 = arith.constant 0 : i32
    %c0_i32_0 = arith.constant 0 : i32
    %c0_i32_1 = arith.constant 0 : i32
    return %c0_i32, %c0_i32_0 : i32, i32
  }
  func.func @transform_13(%arg0: i32) -> (i32, i32) {
    %c0_i32 = arith.constant 0 : i32
    %c0_i32_0 = arith.constant 0 : i32
    %c0_i32_1 = arith.constant 0 : i32
    return %c0_i32, %c0_i32_0 : i32, i32
  }
  func.func @transform_14(%arg0: i32) -> (i32, i32) {
    %c0_i32 = arith.constant 0 : i32
    %c0_i32_0 = arith.constant 0 : i32
    %c0_i32_1 = arith.constant 0 : i32
    return %c0_i32, %c0_i32_0 : i32, i32
  }
  func.func @transform_15(%arg0: i32) -> (i32, i32) {
    %c0_i32 = arith.constant 0 : i32
    %c0_i32_0 = arith.constant 0 : i32
    %c0_i32_1 = arith.constant 0 : i32
    return %c0_i32, %c0_i32_0 : i32, i32
  }
  func.func @transform_16(%arg0: i32) -> (i32, i32) {
    %c0_i32 = arith.constant 0 : i32
    %c0_i32_0 = arith.constant 0 : i32
    %c0_i32_1 = arith.constant 0 : i32
    return %c0_i32, %c0_i32_0 : i32, i32
  }
  func.func @transform_17(%arg0: i32) -> (i32, i32) {
    %c0_i32 = arith.constant 0 : i32
    %c0_i32_0 = arith.constant 0 : i32
    %c0_i32_1 = arith.constant 0 : i32
    return %c0_i32, %c0_i32_0 : i32, i32
  }
  func.func @transform_18(%arg0: i32) -> (i32, i32) {
    %c0_i32 = arith.constant 0 : i32
    %c0_i32_0 = arith.constant 0 : i32
    %c0_i32_1 = arith.constant 0 : i32
    return %c0_i32, %c0_i32_0 : i32, i32
  }
  func.func @transform_19(%arg0: i32) -> (i32, i32) {
    %c0_i32 = arith.constant 0 : i32
    %c0_i32_0 = arith.constant 0 : i32
    %c0_i32_1 = arith.constant 0 : i32
    return %c0_i32, %c0_i32_0 : i32, i32
  }
  func.func @transform_20(%arg0: i32) -> (i32, i32) {
    %c0_i32 = arith.constant 0 : i32
    %c0_i32_0 = arith.constant 0 : i32
    %c0_i32_1 = arith.constant 0 : i32
    return %c0_i32, %c0_i32_0 : i32, i32
  }
  func.func @transform_21(%arg0: i32) -> (i32, i32) {
    %c0_i32 = arith.constant 0 : i32
    %c0_i32_0 = arith.constant 0 : i32
    %c0_i32_1 = arith.constant 0 : i32
    return %c0_i32, %c0_i32_0 : i32, i32
  }
  func.func @transform_22(%arg0: i32) -> (i32, i32) {
    %c0_i32 = arith.constant 0 : i32
    %c0_i32_0 = arith.constant 0 : i32
    %c0_i32_1 = arith.constant 0 : i32
    return %c0_i32, %c0_i32_0 : i32, i32
  }
  func.func @transform_23(%arg0: i32) -> (i32, i32) {
    %c0_i32 = arith.constant 0 : i32
    %c0_i32_0 = arith.constant 0 : i32
    %c0_i32_1 = arith.constant 0 : i32
    return %c0_i32, %c0_i32_0 : i32, i32
  }
  func.func @transform_24(%arg0: i32) -> (i32, i32) {
    %c0_i32 = arith.constant 0 : i32
    %c0_i32_0 = arith.constant 0 : i32
    %c0_i32_1 = arith.constant 0 : i32
    return %c0_i32, %c0_i32_0 : i32, i32
  }
  func.func @transform_25(%arg0: i32) -> (i32, i32) {
    %c0_i32 = arith.constant 0 : i32
    %c0_i32_0 = arith.constant 0 : i32
    %c0_i32_1 = arith.constant 0 : i32
    return %c0_i32, %c0_i32_0 : i32, i32
  }
  func.func @transform_26(%arg0: i32) -> (i32, i32) {
    %c0_i32 = arith.constant 0 : i32
    %c0_i32_0 = arith.constant 0 : i32
    %c0_i32_1 = arith.constant 0 : i32
    return %c0_i32, %c0_i32_0 : i32, i32
  }
  func.func @transform_27(%arg0: i32) -> (i32, i32, i32) {
    %c0_i32 = arith.constant 0 : i32
    %c0_i32_0 = arith.constant 0 : i32
    %c0_i32_1 = arith.constant 0 : i32
    return %arg0, %c0_i32, %c0_i32_0 : i32, i32, i32
  }
}

</mosaic_0001>

<bundles_post_ra>
// kernel: tpu_custom_call.1
= control target key start
LH: loop header
LB: loop body
LE: loop exit
PB: predicated region body
PF: predicated region fallthrough
CT: control target
= control target key end

     0   :  { %s2994_s0 = inlined_call_operand.vmem [shape: f32[2,16,8], index: 0, kind: input, shape index: {}]   ;;  %s2995_s1 = inlined_call_operand.vmem [shape: bf16[24,32], index: 1, kind: input, shape index: {}]   ;;  %s2996_s2 = inlined_call_operand.vmem [shape: f32[1,32], index: 2, kind: input, shape index: {}]   ;;  %s2997_s3 = inlined_call_operand.vmem [shape: bf16[96,16], index: 3, kind: input, shape index: {}]   ;;  %s2998_s4 = inlined_call_operand.vmem [shape: f32[1,16], index: 4, kind: input, shape index: {}]   ;;  %s2999_s5 = inlined_call_operand.vmem [shape: bf16[48,16], index: 5, kind: input, shape index: {}]   ;;  %s3000_s6 = inlined_call_operand.vmem [shape: f32[1,16], index: 6, kind: input, shape index: {}]   ;;  %s3001_s7 = inlined_call_operand.vmem [shape: bf16[16,16], index: 7, kind: input, shape index: {}]   ;;  %s3002_s8 = inlined_call_operand.vmem [shape: f32[1,16], index: 8, kind: input, shape index: {}]   ;;  %s3003_s9 = inlined_call_operand.vmem [shape: bf16[48,16], index: 9, kind: input, shape index: {}]   ;;  %s3004_s10 = inlined_call_operand.vmem [shape: f32[1,16], index: 10, kind: input, shape index: {}]   ;;  %s3005_s11 = inlined_call_operand.vmem [shape: bf16[16,16], index: 11, kind: input, shape index: {}]   ;;  %s3006_s12 = inlined_call_operand.vmem [shape: f32[1,16], index: 12, kind: input, shape index: {}]   ;;  %s3007_s13 = inlined_call_operand.vmem [shape: bf16[48,8], index: 13, kind: input, shape index: {}]   ;;  %s3008_s14 = inlined_call_operand.vmem [shape: f32[1,8], index: 14, kind: input, shape index: {}]   ;;  %s3009_s15 = inlined_call_operand.vmem [shape: bf16[24,8], index: 15, kind: input, shape index: {}]   ;;  %s3010_s16 = inlined_call_operand.vmem [shape: f32[1,8], index: 16, kind: input, shape index: {}]   ;;  %s3011_s17 = inlined_call_operand.vmem [shape: bf16[8,8], index: 17, kind: input, shape index: {}]   ;;  %s3012_s18 = inlined_call_operand.vmem [shape: f32[1,8], index: 18, kind: input, shape index: {}]   ;;  %s3013_s19 = inlined_call_operand.vmem [shape: bf16[24,8], index: 19, kind: input, shape index: {}]   ;;  %s3014_s20 = inlined_call_operand.vmem [shape: f32[1,8], index: 20, kind: input, shape index: {}]   ;;  %s3015_s21 = inlined_call_operand.vmem [shape: bf16[8,8], index: 21, kind: input, shape index: {}]   ;;  %s3016_s22 = inlined_call_operand.vmem [shape: f32[1,8], index: 22, kind: input, shape index: {}]   ;;  %s3017_s23 = inlined_call_operand.vmem [shape: bf16[32,8], index: 23, kind: input, shape index: {}]   ;;  %s3018_s24 = inlined_call_operand.vmem [shape: f32[1,8], index: 24, kind: input, shape index: {}]   ;;  %s3019_s25 = inlined_call_operand.vmem [shape: bf16[24,4], index: 25, kind: input, shape index: {}]   ;;  %s3020_s26 = inlined_call_operand.vmem [shape: f32[1,4], index: 26, kind: input, shape index: {}]   ;;  %s3021_s27 = inlined_call_operand.vmem [shape: f32[2,8,4], index: 27, kind: output, shape index: {}]  }
   0x1   :  { %3028 = sst [smem:[#allocation3_spill]] %s2994_s0 }
   0x2   :  { %3029 = sst [smem:[#allocation4_spill]] %s2995_s1 }
   0x3   :  { %3030 = sst [smem:[#allocation5_spill]] %s2996_s2 }
   0x4   :  { %3031 = sst [smem:[#allocation6_spill]] %s2997_s3 }
   0x5   :  { %3032 = sst [smem:[#allocation7_spill]] %s2998_s4 }
   0x6   :  { %3033 = sst [smem:[#allocation8_spill]] %s2999_s5 }
   0x7   :  { %3034 = sst [smem:[#allocation9_spill]] %s3000_s6 }
   0x8   :  { %3035 = sst [smem:[#allocation10_spill]] %s3001_s7  ;;  %s2617_s7 = smov 0  }
   0x9   :  { %3036 = sst [smem:[#allocation11_spill]] %s3002_s8 }
   0xa   :  { %3037 = sst [smem:[#allocation12_spill]] %s3003_s9 }
   0xb   :  { %3038 = sst [smem:[#allocation13_spill]] %s3004_s10 }
   0xc   :  { %3039 = sst [smem:[#allocation14_spill]] %s3005_s11 }
   0xd LB: > { %s2134_s4 = sadd.s32 4294967295, %s2468_s7   ;;  %p2138_p0 = scmp.ge.s32.totalorder %s2468_s7, 1  ;;  %s2468_s7 = sphi %s2617_s7, %s37_s7  }
   0xe   : > { %p737_p1 = scmp.lt.s32.totalorder %s2468_s7, 3 }
  0x10   : > { %p738_p2 = pnand %p2138_p0, %p737_p1 }
  0x11   : > { %p808_p3 = scmp.lt.s32.totalorder (!%p738_p2), %s2134_s4, 1  ;;  %vm820_vm0 = vcmask (!%p738_p2), 57344   ;;  %v2470_v0 = vmov (!%p738_p2), 0.0   ;;  %vm823_vm1 = vcmask (!%p738_p2), 64512   ;;  %s3040_s5 = sld [smem:[#allocation3_spill]] (!%p738_p2)  ;;  %vm832_vm2 = vcmask (!%p738_p2), 1046528  }
  0x12   : > { %741 = sbr.rel (%p738_p2) target bundleno = 4072 (0xfe8), region = 128  ;;  %821 = vst.msk [vmem:[#allocation2 + $0x7] sm:$0x1] (!%p738_p2), %vm820_vm0, %v2470_v0  ;;  %822 = vst.msk [vmem:[#allocation2 + $0x18] sm:$0x1] (!%p738_p2), %vm820_vm0, %v2470_v0  ;;  %2240 = vmatprep.subr.bf16.mxu0 (!%p738_p2), %v2470_v0  ;;  %2248 = vmatprep.subr.bf16.mxu1 (!%p738_p2), %v2470_v0  ;;  %s3041_s29 = sld [smem:[#allocation4_spill]] (!%p738_p2) }
  0x13   : > { %vm878_vm3 = vcmask (!%p738_p2), 1043456   ;;  %vm844_vm4 = vcmask (!%p738_p2), 1045504   ;;  %vm2471_vm5 = vmmov (!%p738_p2), 0   ;;  %s3026_s11 = smov (!%p738_p2), 8   ;;  %s2473_s2 = smov (!%p738_p2), 16   ;;  %vm858_vm6 = vcmask (!%p738_p2), 130048  }
  0x14   : > { %2244 = vmatprep.mubr.msk.bf16.mxu0 (!%p738_p2), %vm2471_vm5, %v2470_v0  ;;  %2260 = vmatprep.mubr.msk.bf16.mxu1 (!%p738_p2), %vm2471_vm5, %v2470_v0  ;;  %vm874_vm7 = vcmask (!%p738_p2), 195584   ;;  %vm934_vm8 = vcmask (!%p738_p2), 253952   ;;  %s3042_s30 = sld [smem:[#allocation6_spill]] (!%p738_p2)  ;;  %vm937_vm9 = vcmask (!%p738_p2), 261120   ;;  %vm1078_vm10 = vcmask (!%p738_p2), 123904   ;;  %s2474_s10 = smov (!%p738_p2), 32  }
  0x15   : > { %s2475_s1 = smov (!%p738_p2), 64   ;;  %vm970_vm11 = vcmask (!%p738_p2), 523264   ;;  %vm1022_vm12 = vcmask (!%p738_p2), 785408   ;;  %vm1140_vm13 = vcmask (!%p738_p2), 392192   ;;  %s3047_s6 = sld [smem:[#allocation9_spill]] (!%p738_p2)  ;;  %vm1262_vm14 = vcmask (!%p738_p2), 122880  }
  0x16   : > { %s3050_s0 = sld [smem:[#allocation14_spill]] (!%p738_p2)  ;;  %vm1559_vm15 = vcmask (!%p738_p2), 58368  }
  0x18   : > { %v2435_v3 = vld [vmem:[%s3041_s29] sm:$0xff] (!%p738_p2)   ;;  %v2436_v4 = vld [vmem:[%s3041_s29 + $0x8] ss:$0 sps:$4 sm:$0xff] (!%p738_p2)  }
  0x19   : > { %s3054_s4 = smov (!%p808_p3, %s2134_s4), 1  ;;  %2241 = vmatpush3.bf16.msra.mxu0 %v2435_v3  ;;  %v880_v5 = vsel %vm878_vm3, %v2436_v4, 0 }
  0x1a   : > { %s2197_s8 = sshll.u32 %s3054_s4, 4  ;;  %2242 = vmatprep.subr.bf16.mxu0 %v2470_v0  ;;  %v2437_v32 = vld [vmem:[%s3042_s30] sm:$0xff]   ;;  %v2438_v33 = vld [vmem:[%s3042_s30 + $0x8] sm:$0xff]   ;;  %v2439_v34 = vld [vmem:[%s3042_s30 + $0x10] sm:$0xff]  }
  0x1b   : > { %s812_s28 = scalar_lea.vmem %s3040_s5, %s2197_s8  ;;  %2249 = vmatpush3.bf16.msra.mxu1 %v2437_v32  ;;  %v2440_v35 = vld [vmem:[%s3042_s30 + $0x18] sm:$0xff]   ;;  %s3043_s8 = sld [smem:[#allocation5_spill]]  ;;  %v2441_v45 = vld [vmem:[%s3042_s30 + $0x20] sm:$0xff]   ;;  %v2442_v46 = vld [vmem:[%s3042_s30 + $0x28] sm:$0xff]  }
  0x1c   : > { %v818_v1 = vld [vmem:[%s812_s28] sm:$0xff]  ;;  %v819_v2 = vld [vmem:[%s812_s28 + $0x8] sm:$0xff]  ;;  %2250 = vmatprep.subr.bf16.mxu1 %v2470_v0  ;;  %s3046_s28 = sld [smem:[#allocation10_spill]]  ;;  %s3048_s5 = sld [smem:[#allocation12_spill]] }
  0x1d   : > { %824 = vst.msk [vmem:[#allocation2 + $0x8] sm:$0xff] %vm823_vm1, %v818_v1  ;;  %825 = vst.msk [vmem:[#allocation2 + $0x10] sm:$0xff] %vm823_vm1, %v819_v2  ;;  %2243 = vmatpush3.bf16.msra.mxu0 %v880_v5 }
  0x1e   : > { %2264 = vmatprep.subr.bf16.mxu0 %v2470_v0 }
  0x1f   : > { %2251 = vmatpush3.bf16.msra.mxu1 %v2438_v33 }
  0x20   : > { %2252 = vmatprep.subr.bf16.mxu1 %v2470_v0 }
  0x21   : > { %v2145_v36 = vld [vmem:[%s3043_s8] ss:$0 sm:$0xff]  ;;  %s3044_s8 = sld [smem:[#allocation8_spill]] }
  0x23   : > { %2253 = vmatpush3.bf16.msra.mxu1 %v2439_v34 }
  0x24   : > { %v826_v6 = vld [vmem:[#allocation2 + $0x7] sm:$0xff]  ;;  %v827_v7 = vld [vmem:[#allocation2 + $0xf] sm:$0xff]  ;;  %v828_v8 = vld [vmem:[#allocation2 + $0x17] sm:$0x3]  ;;  %2254 = vmatprep.subr.bf16.mxu1 %v2470_v0 }
  0x25   : > { %v833_v9 = vrot.slane %v826_v6, 1  ;;  %v834_v10 = vrot.slane %v827_v7, 1  ;;  %v836_v11 = vrot.slane %v828_v8, 1  ;;  %v845_v12 = vrot.slane %v826_v6, 2  ;;  %935 = vst.msk [vmem:[#allocation2 + $0x7] sm:$0x1] %vm934_vm8, %v2470_v0 }
  0x26   : > { %v846_v13 = vrot.slane %v827_v7, 2  ;;  %v848_v14 = vrot.slane %v828_v8, 2  ;;  %936 = vst.msk [vmem:[#allocation2 + $0x18] sm:$0x1] %vm934_vm8, %v2470_v0 }
  0x27   : > { %v835_v15 = vsel %vm832_vm2, %v833_v9, %v834_v10  ;;  %v837_v16 = vsel %vm832_vm2, %v834_v10, %v836_v11  ;;  %2255 = vmatpush3.bf16.msra.mxu1 %v2440_v35  ;;  %v2443_v10 = vld [vmem:[%s3044_s8] sm:$0xff]   ;;  %v2444_v11 = vld [vmem:[%s3044_s8 + $0x8] sm:$0xff]  }
  0x28   : > { %v2365_v17 = vpack.i.bf16 %v837_v16, %v835_v15  ;;  %v847_v18 = vsel %vm844_vm4, %v845_v12, %v846_v13  ;;  %v849_v19 = vsel %vm844_vm4, %v846_v13, %v848_v14  ;;  %2256 = vmatprep.subr.bf16.mxu1 %v2470_v0 }
  0x29   : > { %v2370_v20 = vpack.i.bf16 %v849_v19, %v847_v18 }
  0x2a   : > { %2366 = vrot.lane.b32.xlu0 %v2365_v17, %s3026_s11  ;;  %s3049_s11 = sld [smem:[#allocation11_spill]] }
  0x2b   : > { %2257 = vmatpush3.bf16.msra.mxu1 %v2441_v45 }
  0x2c   : > { %2258 = vmatprep.subr.bf16.mxu1 %v2470_v0 }
  0x2e   : > { %2371 = vrot.lane.b32.xlu0 %v2370_v20, %s2473_s2 }
  0x2f   : > { %2259 = vmatpush3.bf16.msra.mxu1 %v2442_v46 }
  0x30   : > { %2280 = vmatprep.subr.bf16.mxu1 %v2470_v0 }
  0x9c   : > { %v2367_v21 = vpop.permute.xlu0 %2366 }
  0x9d   : > { %v2369_v22 = vunpack.i.h.bf16 %v2367_v21  ;;  %v2368_v23 = vunpack.i.l.bf16 %v2367_v21  ;;  %v2445_v21 = vld [vmem:[%s3044_s8 + $0x10] sm:$0xff]  }
  0x9f   : > { %v857_v27 = vsel %vm823_vm1, %v827_v7, %v2369_v22  ;;  %v856_v28 = vsel %vm823_vm1, %v826_v6, %v2368_v23 }
  0xa0   : > { %v2372_v24 = vpop.permute.xlu0 %2371 }
  0xa1   : > { %v2374_v25 = vunpack.i.h.bf16 %v2372_v24  ;;  %v2373_v26 = vunpack.i.l.bf16 %v2372_v24 }
  0xa3   : > { %v859_v29 = vsel %vm858_vm6, %v856_v28, %v2373_v26  ;;  %v860_v30 = vsel %vm858_vm6, %v857_v27, %v2374_v25 }
  0xa4   : > { %v861_v31 = vpack.c.bf16 %v860_v30, %v859_v29 }
  0xa6   : > { %2245 = vmatmul.mubr.msk.bf16.vlgmr.msra.gmra.mrb[0].mxu0 %vm874_vm7, %v861_v31 }
  0xa7   : > { %2270 = vmatprep.mubr.msk.bf16.mxu0 %vm2471_vm5, %v2470_v0  ;;  %2265 = vmatpush3.bf16.msra.mxu0 %v2443_v10 }
  0xa8   : > { %2266 = vmatprep.subr.bf16.mxu0 %v2470_v0 }
  0xab   : > { %2267 = vmatpush3.bf16.msra.mxu0 %v2444_v11 }
  0xac   : > { %2268 = vmatprep.subr.bf16.mxu0 %v2470_v0 }
  0xaf   : > { %2269 = vmatpush3.bf16.msra.mxu0 %v2445_v21 }
  0xb0   : > { %2274 = vmatprep.subr.bf16.mxu0 %v2470_v0 }
 0x179   : > { %v916_v37 = vpop.f32.mrb[0].mxu0 }
 0x17a   : > { %v930_v38 = vadd.f32 %v2145_v36, %v916_v37  ;;  %v2246_v39 = vpop.f32.mrb[1].mxu0 }
 0x17b   : > { %v919_v40 = vpop.f32.mrb[2].mxu0 }
 0x17c   : > { %v932_v41 = vmax.f32 %v930_v38, 0.0  ;;  %v931_v42 = vadd.f32 %v2145_v36, %v919_v40  ;;  %v2247_v43 = vpop.f32.mrb[3].mxu0 }
 0x17e   : > { %938 = vst.msk [vmem:[#allocation2 + $0x8] sm:$0xff] %vm937_vm9, %v932_v41  ;;  %v933_v44 = vmax.f32 %v931_v42, 0.0 }
 0x180   : > { %939 = vst.msk [vmem:[#allocation2 + $0x10] sm:$0xff] %vm937_vm9, %v933_v44 }
 0x185   : > { %v940_v47 = vld [vmem:[#allocation2 + $0x7] sm:$0xff] }
 0x186   : > { %1079 = vst.msk [vmem:[#allocation2 + $0x6] sm:$0x3] %vm1078_vm10, %v2470_v0  ;;  %v946_v50 = vrot.slane %v940_v47, 1  ;;  %v957_v57 = vrot.slane %v940_v47, 2 }
 0x187   : > { %v941_v48 = vld [vmem:[#allocation2 + $0xf] sm:$0xff]  ;;  %v942_v49 = vld [vmem:[#allocation2 + $0x17] sm:$0x3] }
 0x188   : > { %1080 = vst.msk [vmem:[#allocation2 + $0x18] sm:$0x3] %vm1078_vm10, %v2470_v0  ;;  %v947_v51 = vrot.slane %v941_v48, 1  ;;  %v949_v52 = vrot.slane %v942_v49, 1  ;;  %v958_v53 = vrot.slane %v941_v48, 2  ;;  %v960_v54 = vrot.slane %v942_v49, 2 }
 0x189   : > { %v2158_v49 = vld [vmem:[%s3047_s6] ss:$0 sm:$0xff]  ;;  %s2476_s6 = smov 24  }
 0x18a   : > { %v948_v55 = vsel %vm832_vm2, %v946_v50, %v947_v51  ;;  %v950_v56 = vsel %vm832_vm2, %v947_v51, %v949_v52  ;;  %v959_v59 = vsel %vm844_vm4, %v957_v57, %v958_v53  ;;  %v961_v60 = vsel %vm844_vm4, %v958_v53, %v960_v54 }
 0x18b   : > { %v2375_v58 = vpack.i.bf16 %v950_v56, %v948_v55  ;;  %v2380_v61 = vpack.i.bf16 %v961_v60, %v959_v59  ;;  %v2447_v59 = vld [vmem:[%s3048_s5] sm:$0xff]   ;;  %v2448_v60 = vld [vmem:[%s3048_s5 + $0x8] sm:$0xff]  }
 0x18d   : > { %2376 = vrot.lane.b32.xlu1 %v2375_v58, %s2474_s10 }
 0x191   : > { %2381 = vrot.lane.b32.xlu1 %v2380_v61, %s2475_s1  ;;  %s3045_s1 = sld [smem:[#allocation7_spill]]  ;;  %v2161_v61 = vld [vmem:[%s3049_s11] ss:$0 sm:$0xff]  ;;  %s3051_s11 = sld [smem:[#allocation13_spill]] }
 0x197   : > { %v2153_v12 = vld [vmem:[%s3045_s1] ss:$0 sm:$0xff] }
 0x1ff   : > { %v2377_v62 = vpop.permute.xlu1 %2376 }
 0x200   : > { %v2379_v63 = vunpack.i.h.bf16 %v2377_v62  ;;  %v2378_v1 = vunpack.i.l.bf16 %v2377_v62 }
 0x202   : > { %v969_v5 = vsel %vm937_vm9, %v941_v48, %v2379_v63  ;;  %v968_v6 = vsel %vm937_vm9, %v940_v47, %v2378_v1  ;;  %v2446_v48 = vld [vmem:[%s3046_s28] sm:$0xff]  }
 0x203   : > { %v2382_v2 = vpop.permute.xlu1 %2381 }
 0x204   : > { %v2384_v3 = vunpack.i.h.bf16 %v2382_v2  ;;  %v2383_v4 = vunpack.i.l.bf16 %v2382_v2 }
 0x206   : > { %v971_v7 = vsel %vm970_vm11, %v968_v6, %v2383_v4  ;;  %v972_v8 = vsel %vm970_vm11, %v969_v5, %v2384_v3 }
 0x207   : > { %v973_v9 = vpack.c.bf16 %v972_v8, %v971_v7 }
 0x209   : > { %2261 = vmatmul.mubr.msk.bf16.vlgmr.msra.gmra.mrb[0].mxu1 %vm1022_vm12, %v973_v9  ;;  %v2449_v9 = vld [vmem:[%s3048_s5 + $0x10] sm:$0xff]  }
 0x20a   : > { %2286 = vmatprep.mubr.msk.bf16.mxu1 %vm2471_vm5, %v2470_v0  ;;  %2281 = vmatpush3.bf16.msra.mxu1 %v2447_v59 }
 0x20b   : > { %2282 = vmatprep.subr.bf16.mxu1 %v2470_v0 }
 0x20e   : > { %2283 = vmatpush3.bf16.msra.mxu1 %v2448_v60 }
 0x20f   : > { %2284 = vmatprep.subr.bf16.mxu1 %v2470_v0 }
 0x212   : > { %2285 = vmatpush3.bf16.msra.mxu1 %v2449_v9 }
 0x213   : > { %2306 = vmatprep.subr.bf16.mxu1 %v2470_v0 }
 0x2dc   : > { %v1060_v13 = vpop.f32.mrb[0].mxu1 }
 0x2dd   : > { %v2718_v14 = vadd.f32 %v2153_v12, %v1060_v13  ;;  %v2262_v15 = vpop.f32.mrb[1].mxu1 }
 0x2de   : > { %v1063_v16 = vpop.f32.mrb[2].mxu1 }
 0x2df   : > { %v1076_v17 = vmax.f32 %v2718_v14, 0.0  ;;  %v2721_v18 = vadd.f32 %v2153_v12, %v1063_v16  ;;  %v2263_v19 = vpop.f32.mrb[3].mxu1 }
 0x2e1   : > { %1081 = vst.msk [vmem:[#allocation2 + $0x8] sm:$0xff] %vm858_vm6, %v1076_v17  ;;  %v1077_v20 = vmax.f32 %v2721_v18, 0.0 }
 0x2e3   : > { %1082 = vst.msk [vmem:[#allocation2 + $0x10] sm:$0xff] %vm858_vm6, %v1077_v20 }
 0x2e8   : > { %v1083_v22 = vld [vmem:[#allocation2 + $0x6] sm:$0xff] }
 0x2e9   : > { %v1100_v25 = vrot.slane %v1083_v22, 4  ;;  %v1089_v26 = vrot.slane %v1083_v22, 2  ;;  %1263 = vst.msk [vmem:[#allocation2 + $0x7] sm:$0x1] %vm1262_vm14, %v2470_v0 }
 0x2ea   : > { %v1084_v23 = vld [vmem:[#allocation2 + $0xe] sm:$0xff]  ;;  %v1085_v24 = vld [vmem:[#allocation2 + $0x16] sm:$0xf] }
 0x2eb   : > { %v1101_v27 = vrot.slane %v1084_v23, 4  ;;  %v1103_v28 = vrot.slane %v1085_v24, 4  ;;  %v1090_v29 = vrot.slane %v1084_v23, 2  ;;  %v1092_v30 = vrot.slane %v1085_v24, 2  ;;  %1264 = vst.msk [vmem:[#allocation2 + $0x18] sm:$0x1] %vm1262_vm14, %v2470_v0 }
 0x2ed   : > { %v1102_v31 = vsel %vm878_vm3, %v1100_v25, %v1101_v27  ;;  %v1104_v32 = vsel %vm878_vm3, %v1101_v27, %v1103_v28  ;;  %v1091_v33 = vsel %vm844_vm4, %v1089_v26, %v1090_v29  ;;  %v1093_v34 = vsel %vm844_vm4, %v1090_v29, %v1092_v30 }
 0x2ee   : > { %v2390_v35 = vpack.i.bf16 %v1104_v32, %v1102_v31  ;;  %v2385_v36 = vpack.i.bf16 %v1093_v34, %v1091_v33 }
 0x2f0   : > { %2391 = vrot.lane.b32.xlu1 %v2390_v35, %s2474_s10  ;;  %2386 = vrot.lane.b32.xlu0 %v2385_v36, %s2473_s2  ;;  %v2450_v36 = vld [vmem:[%s3050_s0] sm:$0xff]  }
 0x362   : > { %v2392_v37 = vpop.permute.xlu1 %2391  ;;  %v2387_v38 = vpop.permute.xlu0 %2386 }
 0x363   : > { %v2394_v39 = vunpack.i.h.bf16 %v2392_v37  ;;  %v2393_v40 = vunpack.i.l.bf16 %v2392_v37  ;;  %v2389_v41 = vunpack.i.h.bf16 %v2387_v38  ;;  %v2388_v42 = vunpack.i.l.bf16 %v2387_v38  ;;  %v2166_v37 = vld [vmem:[%s3051_s11] ss:$0 sm:$0xff]  ;;  %s3052_s11 = smov 8  }
 0x365   : > { %v1112_v43 = vsel %vm858_vm6, %v1084_v23, %v2389_v41  ;;  %v1111_v44 = vsel %vm858_vm6, %v1083_v22, %v2388_v42 }
 0x366   : > { %v1114_v45 = vsel %vm937_vm9, %v1112_v43, %v2394_v39  ;;  %v1113_v46 = vsel %vm937_vm9, %v1111_v44, %v2393_v40 }
 0x367   : > { %v1115_v47 = vpack.c.bf16 %v1114_v45, %v1113_v46 }
 0x369   : > { %2271 = vmatmul.mubr.msk.bf16.vlgmr.msra.gmra.mrb[4].mxu0 %vm1140_vm13, %v1115_v47  ;;  %v2451_v47 = vld [vmem:[%s3007_s13] sm:$0xff]  }
 0x36a   : > { %2276 = vmatprep.mubr.msk.bf16.mxu0 %vm2471_vm5, %v2470_v0  ;;  %2275 = vmatpush3.bf16.msra.mxu0 %v2446_v48  ;;  %v2452_v48 = vld [vmem:[%s3007_s13 + $0x8] sm:$0xff]  }
 0x36b   : > { %2290 = vmatprep.subr.bf16.mxu0 %v2470_v0 }
 0x43c   : > { %v1178_v50 = vpop.f32.mrb[4].mxu0 }
 0x43d   : > { %v1192_v51 = vadd.f32 %v2158_v49, %v1178_v50  ;;  %v2272_v52 = vpop.f32.mrb[5].mxu0 }
 0x43e   : > { %v1181_v53 = vpop.f32.mrb[6].mxu0 }
 0x43f   : > { %v1193_v54 = vadd.f32 %v2158_v49, %v1181_v53  ;;  %v2273_v55 = vpop.f32.mrb[7].mxu0  ;;  %v1194_v56 = vmax.f32 %v1192_v51, 0.0  ;;  %v2169_v49 = vld [vmem:[%s3006_s12] ss:$0 sm:$0xff] }
 0x441   : > { %v1195_v57 = vmax.f32 %v1193_v54, 0.0 }
 0x443   : > { %v1196_v58 = vpack.c.bf16 %v1195_v57, %v1194_v56 }
 0x445   : > { %2277 = vmatmul.mubr.msk.bf16.vlgmr.msra.gmra.mrb[8].mxu0 %vm858_vm6, %v1196_v58  ;;  %v2453_v58 = vld [vmem:[%s3007_s13 + $0x10] sm:$0xff]  }
 0x446   : > { %2292 = vmatprep.mubr.msk.bf16.mxu0 %vm2471_vm5, %v2470_v0  ;;  %2291 = vmatpush3.bf16.msra.mxu0 %v2450_v36 }
 0x447   : > { %2296 = vmatprep.subr.bf16.mxu0 %v2470_v0 }
 0x518   : > { %v1242_v62 = vpop.f32.mrb[8].mxu0 }
 0x519   : > { %v1256_v63 = vadd.f32 %v2161_v61, %v1242_v62  ;;  %v2278_v1 = vpop.f32.mrb[9].mxu0 }
 0x51a   : > { %v1245_v2 = vpop.f32.mrb[10].mxu0 }
 0x51b   : > { %v2769_v3 = vadd.f32 %v1256_v63, %v2718_v14  ;;  %v1257_v4 = vadd.f32 %v2161_v61, %v1245_v2  ;;  %v2279_v5 = vpop.f32.mrb[11].mxu0 }
 0x51d   : > { %v1260_v6 = vmax.f32 %v2769_v3, 0.0  ;;  %v2773_v7 = vadd.f32 %v1257_v4, %v2721_v18 }
 0x51f   : > { %1265 = vst.msk [vmem:[#allocation2 + $0x8] sm:$0xff] %vm858_vm6, %v1260_v6  ;;  %v1261_v8 = vmax.f32 %v2773_v7, 0.0 }
 0x521   : > { %1266 = vst.msk [vmem:[#allocation2 + $0x10] sm:$0xff] %vm858_vm6, %v1261_v8 }
 0x526   : > { %v1267_v10 = vld [vmem:[#allocation2 + $0x7] sm:$0xff] }
 0x527   : > { %1443 = vst.msk [vmem:[#allocation2 + $0x7] sm:$0x1] %vm1262_vm14, %v2470_v0  ;;  %v1284_v13 = vrot.slane %v1267_v10, 2  ;;  %v1273_v14 = vrot.slane %v1267_v10, 1 }
 0x528   : > { %v1268_v11 = vld [vmem:[#allocation2 + $0xf] sm:$0xff]  ;;  %v1269_v12 = vld [vmem:[#allocation2 + $0x17] sm:$0x3] }
 0x529   : > { %v1285_v15 = vrot.slane %v1268_v11, 2  ;;  %v1287_v16 = vrot.slane %v1269_v12, 2  ;;  %1444 = vst.msk [vmem:[#allocation2 + $0x18] sm:$0x1] %vm1262_vm14, %v2470_v0  ;;  %v1274_v17 = vrot.slane %v1268_v11, 1  ;;  %v1276_v18 = vrot.slane %v1269_v12, 1 }
 0x52b   : > { %v1286_v19 = vsel %vm844_vm4, %v1284_v13, %v1285_v15  ;;  %v1288_v20 = vsel %vm844_vm4, %v1285_v15, %v1287_v16  ;;  %v1275_v21 = vsel %vm832_vm2, %v1273_v14, %v1274_v17  ;;  %v1277_v22 = vsel %vm832_vm2, %v1274_v17, %v1276_v18 }
 0x52c   : > { %v2400_v23 = vpack.i.bf16 %v1288_v20, %v1286_v19  ;;  %v2395_v24 = vpack.i.bf16 %v1277_v22, %v1275_v21  ;;  %v2454_v22 = vld [vmem:[%s3009_s15] sm:$0xff]  }
 0x52e   : > { %2401 = vrot.lane.b32.xlu1 %v2400_v23, %s2474_s10  ;;  %2396 = vrot.lane.b32.xlu0 %v2395_v24, %s2473_s2  ;;  %v2174_v23 = vld [vmem:[%s3008_s14] ss:$0 sm:$0xff] }
 0x5a0   : > { %v2402_v25 = vpop.permute.xlu1 %2401  ;;  %v2397_v26 = vpop.permute.xlu0 %2396 }
 0x5a1   : > { %v2404_v27 = vunpack.i.h.bf16 %v2402_v25  ;;  %v2403_v28 = vunpack.i.l.bf16 %v2402_v25  ;;  %v2399_v29 = vunpack.i.h.bf16 %v2397_v26  ;;  %v2398_v30 = vunpack.i.l.bf16 %v2397_v26 }
 0x5a3   : > { %v1296_v31 = vsel %vm858_vm6, %v1268_v11, %v2399_v29  ;;  %v1295_v32 = vsel %vm858_vm6, %v1267_v10, %v2398_v30 }
 0x5a4   : > { %v1298_v33 = vsel %vm937_vm9, %v1296_v31, %v2404_v27  ;;  %v1297_v34 = vsel %vm937_vm9, %v1295_v32, %v2403_v28  ;;  %v2455_v32 = vld [vmem:[%s3009_s15 + $0x8] ss:$0 sps:$4 sm:$0xff]  }
 0x5a5   : > { %v1299_v35 = vpack.c.bf16 %v1298_v33, %v1297_v34  ;;  %v1613_v33 = vsel %vm878_vm3, %v2455_v32, 0 }
 0x5a7   : > { %2287 = vmatmul.mubr.msk.bf16.vlgmr.msra.gmra.mrb[4].mxu1 %vm1140_vm13, %v1299_v35 }
 0x5a8   : > { %2310 = vmatprep.mubr.msk.bf16.mxu1 %vm2471_vm5, %v2470_v0  ;;  %2307 = vmatpush3.bf16.msra.mxu1 %v2454_v22 }
 0x5a9   : > { %2308 = vmatprep.subr.bf16.mxu1 %v2470_v0 }
 0x5ac   : > { %2309 = vmatpush3.bf16.msra.mxu1 %v1613_v33 }
 0x5ad   : > { %2314 = vmatprep.subr.bf16.mxu1 %v2470_v0 }
 0x67a   : > { %v1361_v38 = vpop.f32.mrb[4].mxu1 }
 0x67b   : > { %v1375_v39 = vadd.f32 %v2166_v37, %v1361_v38  ;;  %v2288_v40 = vpop.f32.mrb[5].mxu1 }
 0x67c   : > { %v1364_v41 = vpop.f32.mrb[6].mxu1 }
 0x67d   : > { %v1376_v42 = vadd.f32 %v2166_v37, %v1364_v41  ;;  %v2289_v43 = vpop.f32.mrb[7].mxu1  ;;  %v1377_v44 = vmax.f32 %v1375_v39, 0.0 }
 0x67f   : > { %v1378_v45 = vmax.f32 %v1376_v42, 0.0 }
 0x681   : > { %v1379_v46 = vpack.c.bf16 %v1378_v45, %v1377_v44 }
 0x683   : > { %2293 = vmatmul.mubr.msk.bf16.vlgmr.msra.gmra.mrb[12].mxu0 %vm858_vm6, %v1379_v46 }
 0x684   : > { %2302 = vmatprep.mubr.msk.bf16.mxu0 %vm2471_vm5, %v2470_v0  ;;  %2297 = vmatpush3.bf16.msra.mxu0 %v2451_v47 }
 0x685   : > { %2298 = vmatprep.subr.bf16.mxu0 %v2470_v0 }
 0x688   : > { %2299 = vmatpush3.bf16.msra.mxu0 %v2452_v48 }
 0x689   : > { %2300 = vmatprep.subr.bf16.mxu0 %v2470_v0 }
 0x68c   : > { %2301 = vmatpush3.bf16.msra.mxu0 %v2453_v58 }
 0x68d   : > { %2320 = vmatprep.subr.bf16.mxu0 %v2470_v0 }
 0x756   : > { %v1425_v50 = vpop.f32.mrb[12].mxu0 }
 0x757   : > { %v1439_v51 = vadd.f32 %v2169_v49, %v1425_v50  ;;  %v2294_v52 = vpop.f32.mrb[13].mxu0 }
 0x758   : > { %v1428_v53 = vpop.f32.mrb[14].mxu0 }
 0x759   : > { %v1441_v54 = vadd.f32 %v1439_v51, %v2769_v3  ;;  %v1440_v55 = vadd.f32 %v2169_v49, %v1428_v53  ;;  %v2295_v56 = vpop.f32.mrb[15].mxu0 }
 0x75b   : > { %1445 = vst.msk [vmem:[#allocation2 + $0x8] sm:$0xff] %vm858_vm6, %v1441_v54  ;;  %v1442_v57 = vadd.f32 %v1440_v55, %v2773_v7 }
 0x75d   : > { %1446 = vst.msk [vmem:[#allocation2 + $0x10] sm:$0xff] %vm858_vm6, %v1442_v57 }
 0x762   : > { %v1447_v59 = vld [vmem:[#allocation2 + $0x7] sm:$0xff] }
 0x763   : > { %1560 = vst.msk [vmem:[#allocation2 + $0x6] sm:$0x3] %vm1559_vm15, %v2470_v0  ;;  %v1464_v62 = vrot.slane %v1447_v59, 2  ;;  %v1453_v63 = vrot.slane %v1447_v59, 1 }
 0x764   : > { %v1448_v60 = vld [vmem:[#allocation2 + $0xf] sm:$0xff]  ;;  %v1449_v61 = vld [vmem:[#allocation2 + $0x17] sm:$0x3] }
 0x765   : > { %v1465_v1 = vrot.slane %v1448_v60, 2  ;;  %v1467_v2 = vrot.slane %v1449_v61, 2  ;;  %1561 = vst.msk [vmem:[#allocation2 + $0x18] sm:$0x3] %vm1559_vm15, %v2470_v0  ;;  %v1454_v3 = vrot.slane %v1448_v60, 1  ;;  %v1456_v4 = vrot.slane %v1449_v61, 1 }
 0x767   : > { %v1466_v5 = vsel %vm844_vm4, %v1464_v62, %v1465_v1  ;;  %v1468_v6 = vsel %vm844_vm4, %v1465_v1, %v1467_v2  ;;  %v1455_v7 = vsel %vm832_vm2, %v1453_v63, %v1454_v3  ;;  %v1457_v8 = vsel %vm832_vm2, %v1454_v3, %v1456_v4  ;;  %v2178_v62 = vld [vmem:[%s3010_s16] ss:$0 sm:$0xff] }
 0x768   : > { %v2410_v9 = vpack.i.bf16 %v1468_v6, %v1466_v5  ;;  %v2405_v10 = vpack.i.bf16 %v1457_v8, %v1455_v7 }
 0x76a   : > { %2411 = vrot.lane.b32.xlu1 %v2410_v9, %s2474_s10  ;;  %2406 = vrot.lane.b32.xlu0 %v2405_v10, %s2473_s2  ;;  %v2456_v9 = vld [vmem:[%s3013_s19] sm:$0xff]  }
 0x76b   : > { %v2180_v10 = vld [vmem:[%s3012_s18] ss:$0 sm:$0xff] }
 0x7dc   : > { %v2412_v11 = vpop.permute.xlu1 %2411  ;;  %v2407_v12 = vpop.permute.xlu0 %2406 }
 0x7dd   : > { %v2414_v13 = vunpack.i.h.bf16 %v2412_v11  ;;  %v2413_v14 = vunpack.i.l.bf16 %v2412_v11  ;;  %v2409_v15 = vunpack.i.h.bf16 %v2407_v12  ;;  %v2408_v16 = vunpack.i.l.bf16 %v2407_v12 }
 0x7df   : > { %v1476_v17 = vsel %vm858_vm6, %v1448_v60, %v2409_v15  ;;  %v1475_v18 = vsel %vm858_vm6, %v1447_v59, %v2408_v16  ;;  %v1668_v60 = vld [vmem:[%s3011_s17] sm:$0xf] }
 0x7e0   : > { %v1478_v19 = vsel %vm937_vm9, %v1476_v17, %v2414_v13  ;;  %v1477_v20 = vsel %vm937_vm9, %v1475_v18, %v2413_v14  ;;  %v1673_v61 = vsel %vm878_vm3, %v1668_v60, 0 }
 0x7e1   : > { %v1479_v21 = vpack.c.bf16 %v1478_v19, %v1477_v20 }
 0x7e3   : > { %2303 = vmatmul.mubr.msk.bf16.vlgmr.msra.gmra.mrb[16].mxu0 %vm1140_vm13, %v1479_v21  ;;  %v2457_v21 = vld [vmem:[%s3013_s19 + $0x8] ss:$0 sps:$4 sm:$0xff]  }
 0x7e4   : > { %2324 = vmatprep.mubr.msk.bf16.mxu0 %vm2471_vm5, %v2470_v0  ;;  %2321 = vmatpush3.bf16.msra.mxu0 %v2456_v9  ;;  %v1782_v22 = vsel %vm878_vm3, %v2457_v21, 0  ;;  %v2190_v21 = vld [vmem:[%s3018_s24] ss:$0 sm:$0xff] }
 0x7e5   : > { %2322 = vmatprep.subr.bf16.mxu0 %v2470_v0 }
 0x7e8   : > { %2323 = vmatpush3.bf16.msra.mxu0 %v1782_v22 }
 0x7e9   : > { %2334 = vmatprep.subr.bf16.mxu0 %v2470_v0 }
 0x8b6   : > { %v1541_v24 = vpop.f32.mrb[16].mxu0 }
 0x8b7   : > { %v2850_v25 = vadd.f32 %v2174_v23, %v1541_v24  ;;  %v2304_v26 = vpop.f32.mrb[17].mxu0 }
 0x8b8   : > { %v1544_v27 = vpop.f32.mrb[18].mxu0 }
 0x8b9   : > { %v1557_v28 = vmax.f32 %v2850_v25, 0.0  ;;  %v2853_v29 = vadd.f32 %v2174_v23, %v1544_v27  ;;  %v2305_v30 = vpop.f32.mrb[19].mxu0 }
 0x8bb   : > { %1562 = vst.msk [vmem:[#allocation2 + $0x8] sm:$0xff] %vm823_vm1, %v1557_v28  ;;  %v1558_v31 = vmax.f32 %v2853_v29, 0.0 }
 0x8bd   : > { %1563 = vst.msk [vmem:[#allocation2 + $0x10] sm:$0xff] %vm823_vm1, %v1558_v31 }
 0x8c2   : > { %v1564_v34 = vld [vmem:[#allocation2 + $0x6] sm:$0xff] }
 0x8c3   : > { %1729 = vst.msk [vmem:[#allocation2 + $0x7] sm:$0x1] %vm820_vm0, %v2470_v0  ;;  %v1581_v37 = vrot.slane %v1564_v34, 4  ;;  %v1570_v38 = vrot.slane %v1564_v34, 2 }
 0x8c4   : > { %v1565_v35 = vld [vmem:[#allocation2 + $0xe] sm:$0xff]  ;;  %v1566_v36 = vld [vmem:[#allocation2 + $0x16] sm:$0xf] }
 0x8c5   : > { %v1582_v39 = vrot.slane %v1565_v35, 4  ;;  %v1584_v40 = vrot.slane %v1566_v36, 4  ;;  %1730 = vst.msk [vmem:[#allocation2 + $0x18] sm:$0x1] %vm820_vm0, %v2470_v0  ;;  %v1571_v41 = vrot.slane %v1565_v35, 2  ;;  %v1573_v42 = vrot.slane %v1566_v36, 2 }
 0x8c7   : > { %v1583_v43 = vsel %vm878_vm3, %v1581_v37, %v1582_v39  ;;  %v1585_v44 = vsel %vm878_vm3, %v1582_v39, %v1584_v40  ;;  %v1572_v45 = vsel %vm844_vm4, %v1570_v38, %v1571_v41  ;;  %v1574_v46 = vsel %vm844_vm4, %v1571_v41, %v1573_v42 }
 0x8c8   : > { %v2420_v47 = vpack.i.bf16 %v1585_v44, %v1583_v43  ;;  %v2415_v48 = vpack.i.bf16 %v1574_v46, %v1572_v45 }
 0x8ca   : > { %2421 = vrot.lane.b32.xlu1 %v2420_v47, %s2473_s2  ;;  %2416 = vrot.lane.b32.xlu0 %v2415_v48, %s3052_s11 }
 0x93c   : > { %v2422_v49 = vpop.permute.xlu1 %2421  ;;  %v2417_v50 = vpop.permute.xlu0 %2416 }
 0x93d   : > { %v2424_v51 = vunpack.i.h.bf16 %v2422_v49  ;;  %v2423_v52 = vunpack.i.l.bf16 %v2422_v49  ;;  %v2419_v53 = vunpack.i.h.bf16 %v2417_v50  ;;  %v2418_v54 = vunpack.i.l.bf16 %v2417_v50  ;;  %v1837_v49 = vld [vmem:[%s3015_s21] sm:$0xf] }
 0x93e   : > { %v1842_v50 = vsel %vm878_vm3, %v1837_v49, 0 }
 0x93f   : > { %v1593_v55 = vsel %vm823_vm1, %v1565_v35, %v2419_v53  ;;  %v1592_v56 = vsel %vm823_vm1, %v1564_v34, %v2418_v54 }
 0x940   : > { %v1595_v57 = vsel %vm858_vm6, %v1593_v55, %v2424_v51  ;;  %v1594_v58 = vsel %vm858_vm6, %v1592_v56, %v2423_v52  ;;  %v2184_v51 = vld [vmem:[%s3014_s20] ss:$0 sm:$0xff] }
 0x941   : > { %v1596_v59 = vpack.c.bf16 %v1595_v57, %v1594_v58 }
 0x943   : > { %2311 = vmatmul.mubr.msk.bf16.vlgmr.msra.gmra.mrb[8].mxu1 %vm874_vm7, %v1596_v59 }
 0x944   : > { %2316 = vmatprep.mubr.msk.bf16.mxu1 %vm2471_vm5, %v2470_v0  ;;  %2315 = vmatpush3.bf16.msra.mxu1 %v1673_v61  ;;  %v2458_v61 = vld [vmem:[%s3017_s23] sm:$0xff]  }
 0x945   : > { %2328 = vmatprep.subr.bf16.mxu1 %v2470_v0 }
 0xa16   : > { %v1649_v63 = vpop.f32.mrb[8].mxu1 }
 0xa17   : > { %v1663_v1 = vadd.f32 %v2178_v62, %v1649_v63  ;;  %v2312_v2 = vpop.f32.mrb[9].mxu1 }
 0xa18   : > { %v1652_v3 = vpop.f32.mrb[10].mxu1 }
 0xa19   : > { %v1664_v4 = vadd.f32 %v2178_v62, %v1652_v3  ;;  %v2313_v5 = vpop.f32.mrb[11].mxu1  ;;  %v1665_v6 = vmax.f32 %v1663_v1, 0.0  ;;  %v2186_v62 = vld [vmem:[%s3016_s22] ss:$0 sm:$0xff] }
 0xa1b   : > { %v1666_v7 = vmax.f32 %v1664_v4, 0.0  ;;  %v2459_v4 = vld [vmem:[%s3017_s23 + $0x8] sm:$0xff]  }
 0xa1d   : > { %v1667_v8 = vpack.c.bf16 %v1666_v7, %v1665_v6 }
 0xa1f   : > { %2317 = vmatmul.mubr.msk.bf16.vlgmr.msra.gmra.mrb[12].mxu1 %vm823_vm1, %v1667_v8 }
 0xa20   : > { %2330 = vmatprep.mubr.msk.bf16.mxu1 %vm2471_vm5, %v2470_v0  ;;  %2329 = vmatpush3.bf16.msra.mxu1 %v1842_v50 }
 0xa21   : > { %2342 = vmatprep.subr.bf16.mxu1 %v2470_v0 }
 0xaf2   : > { %v1709_v11 = vpop.f32.mrb[12].mxu1 }
 0xaf3   : > { %v1723_v12 = vadd.f32 %v2180_v10, %v1709_v11  ;;  %v2318_v13 = vpop.f32.mrb[13].mxu1 }
 0xaf4   : > { %v1712_v14 = vpop.f32.mrb[14].mxu1 }
 0xaf5   : > { %v2899_v15 = vadd.f32 %v1723_v12, %v2850_v25  ;;  %v1724_v16 = vadd.f32 %v2180_v10, %v1712_v14  ;;  %v2319_v17 = vpop.f32.mrb[15].mxu1 }
 0xaf7   : > { %v1727_v18 = vmax.f32 %v2899_v15, 0.0  ;;  %v2903_v19 = vadd.f32 %v1724_v16, %v2853_v29 }
 0xaf9   : > { %1731 = vst.msk [vmem:[#allocation2 + $0x8] sm:$0xff] %vm823_vm1, %v1727_v18  ;;  %v1728_v20 = vmax.f32 %v2903_v19, 0.0 }
 0xafb   : > { %1732 = vst.msk [vmem:[#allocation2 + $0x10] sm:$0xff] %vm823_vm1, %v1728_v20  ;;  %v2460_v20 = vld [vmem:[%s3019_s25] sm:$0xff]  }
 0xb00   : > { %v1733_v23 = vld [vmem:[#allocation2 + $0x7] sm:$0xff] }
 0xb01   : > { %1896 = vst.msk [vmem:[#allocation2 + $0x7] sm:$0x1] %vm820_vm0, %v2470_v0  ;;  %v1750_v26 = vrot.slane %v1733_v23, 2  ;;  %v1739_v27 = vrot.slane %v1733_v23, 1 }
 0xb02   : > { %v1734_v24 = vld [vmem:[#allocation2 + $0xf] sm:$0xff]  ;;  %v1735_v25 = vld [vmem:[#allocation2 + $0x17] sm:$0x3] }
 0xb03   : > { %v1751_v28 = vrot.slane %v1734_v24, 2  ;;  %v1753_v29 = vrot.slane %v1735_v25, 2  ;;  %1897 = vst.msk [vmem:[#allocation2 + $0x18] sm:$0x1] %vm820_vm0, %v2470_v0  ;;  %v1740_v30 = vrot.slane %v1734_v24, 1  ;;  %v1742_v31 = vrot.slane %v1735_v25, 1 }
 0xb05   : > { %v1752_v32 = vsel %vm844_vm4, %v1750_v26, %v1751_v28  ;;  %v1754_v33 = vsel %vm844_vm4, %v1751_v28, %v1753_v29  ;;  %v1741_v34 = vsel %vm832_vm2, %v1739_v27, %v1740_v30  ;;  %v1743_v35 = vsel %vm832_vm2, %v1740_v30, %v1742_v31 }
 0xb06   : > { %v2430_v36 = vpack.i.bf16 %v1754_v33, %v1752_v32  ;;  %v2425_v37 = vpack.i.bf16 %v1743_v35, %v1741_v34 }
 0xb08   : > { %2431 = vrot.lane.b32.xlu1 %v2430_v36, %s2473_s2  ;;  %2426 = vrot.lane.b32.xlu0 %v2425_v37, %s3052_s11 }
 0xb7a   : > { %v2432_v38 = vpop.permute.xlu1 %2431  ;;  %v2427_v39 = vpop.permute.xlu0 %2426 }
 0xb7b   : > { %v2434_v40 = vunpack.i.h.bf16 %v2432_v38  ;;  %v2433_v41 = vunpack.i.l.bf16 %v2432_v38  ;;  %v2429_v42 = vunpack.i.h.bf16 %v2427_v39  ;;  %v2428_v43 = vunpack.i.l.bf16 %v2427_v39 }
 0xb7d   : > { %v1762_v44 = vsel %vm823_vm1, %v1734_v24, %v2429_v42  ;;  %v1761_v45 = vsel %vm823_vm1, %v1733_v23, %v2428_v43  ;;  %v2461_v23 = vld [vmem:[%s3019_s25 + $0x8] ss:$0 sps:$4 sm:$0xff]  }
 0xb7e   : > { %v1764_v46 = vsel %vm858_vm6, %v1762_v44, %v2434_v40  ;;  %v1763_v47 = vsel %vm858_vm6, %v1761_v45, %v2433_v41  ;;  %v2029_v27 = vsel %vm878_vm3, %v2461_v23, 0  ;;  %v2194_v41 = vld [vmem:[%s3020_s26] ss:$0 sm:$0xff] }
 0xb7f   : > { %v1765_v48 = vpack.c.bf16 %v1764_v46, %v1763_v47 }
 0xb81   : > { %2325 = vmatmul.mubr.msk.bf16.vlgmr.msra.gmra.mrb[20].mxu0 %vm874_vm7, %v1765_v48 }
 0xb82   : > { %2338 = vmatprep.mubr.msk.bf16.mxu0 %vm2471_vm5, %v2470_v0  ;;  %2335 = vmatpush3.bf16.msra.mxu0 %v2458_v61 }
 0xb83   : > { %2336 = vmatprep.subr.bf16.mxu0 %v2470_v0 }
 0xb86   : > { %2337 = vmatpush3.bf16.msra.mxu0 %v2459_v4 }
 0xc54   : > { %v1818_v52 = vpop.f32.mrb[20].mxu0 }
 0xc55   : > { %v1832_v53 = vadd.f32 %v2184_v51, %v1818_v52  ;;  %v2326_v54 = vpop.f32.mrb[21].mxu0 }
 0xc56   : > { %v1821_v55 = vpop.f32.mrb[22].mxu0 }
 0xc57   : > { %v1833_v56 = vadd.f32 %v2184_v51, %v1821_v55  ;;  %v2327_v57 = vpop.f32.mrb[23].mxu0  ;;  %v1834_v58 = vmax.f32 %v1832_v53, 0.0 }
 0xc59   : > { %v1835_v59 = vmax.f32 %v1833_v56, 0.0 }
 0xc5b   : > { %v1836_v60 = vpack.c.bf16 %v1835_v59, %v1834_v58 }
 0xc5d   : > { %2331 = vmatmul.mubr.msk.bf16.vlgmr.msra.gmra.mrb[16].mxu1 %vm823_vm1, %v1836_v60 }
 0xc5e   : > { %2346 = vmatprep.mubr.msk.bf16.mxu1 %vm2471_vm5, %v2470_v0  ;;  %2343 = vmatpush3.bf16.msra.mxu1 %v2460_v20 }
 0xc5f   : > { %2344 = vmatprep.subr.bf16.mxu1 %v2470_v0 }
 0xc62   : > { %2345 = vmatpush3.bf16.msra.mxu1 %v2029_v27 }
 0xd30   : > { %v1878_v63 = vpop.f32.mrb[16].mxu1 }
 0xd31   : > { %v1892_v1 = vadd.f32 %v2186_v62, %v1878_v63  ;;  %v2332_v2 = vpop.f32.mrb[17].mxu1 }
 0xd32   : > { %v1881_v3 = vpop.f32.mrb[18].mxu1 }
 0xd33   : > { %v1894_v5 = vadd.f32 %v1892_v1, %v2899_v15  ;;  %v1893_v6 = vadd.f32 %v2186_v62, %v1881_v3  ;;  %v2333_v7 = vpop.f32.mrb[19].mxu1 }
 0xd35   : > { %1898 = vst.msk [vmem:[#allocation2 + $0x8] sm:$0xff] %vm823_vm1, %v1894_v5  ;;  %v1895_v8 = vadd.f32 %v1893_v6, %v2903_v19 }
 0xd37   : > { %1899 = vst.msk [vmem:[#allocation2 + $0x10] sm:$0xff] %vm823_vm1, %v1895_v8 }
 0xd3e   : > { %v1905_v9 = vld [vmem:[#allocation2 + $0x9] ss:$2 sm:$0xff]  ;;  %v1903_v10 = vld [vmem:[#allocation2 + $0x8] ss:$2 sm:$0xff] }
 0xd3f   : > { %v1907_v11 = vld [vmem:[#allocation2 + $0xa] ss:$2 sm:$0xff]  ;;  %1913 = vrot.lane.b32.xlu1 %v1905_v9, %s2473_s2  ;;  %1909 = vrot.lane.b32.xlu0 %v1903_v10, %s3052_s11  ;;  %v1901_v12 = vld [vmem:[#allocation2 + $0x7] ss:$2 sm:$0xff] }
 0xd40   : > { %1992 = vst.msk [vmem:[#allocation2 + $0x10] sm:$0x1] %vm820_vm0, %v2470_v0  ;;  %1991 = vst.msk [vmem:[#allocation2 + $0x7] sm:$0x1] %vm820_vm0, %v2470_v0  ;;  %vm2079_vm0 = vcmask 31744  }
 0xd43   : > { %1917 = vrot.lane.b32.xlu0 %v1907_v11, %s2476_s6  ;;  %s2141_s6 = sshll.u32 %s3054_s4, 3 }
 0xdb1   : > { %v1910_v13 = vpop.permute.xlu0 %1909  ;;  %v1914_v14 = vpop.permute.xlu1 %1913 }
 0xdb2   : > { %v1920_v15 = vsel %vm823_vm1, %v1901_v12, %v1910_v13 }
 0xdb3   : > { %v1921_v17 = vsel %vm858_vm6, %v1920_v15, %v1914_v14 }
 0xdb5   : > { %v1918_v16 = vpop.permute.xlu0 %1917 }
 0xdb6   : > { %v1922_v18 = vsel %vm874_vm7, %v1921_v17, %v1918_v16 }
 0xdb7   : > { %v1923_v19 = vpack.c.bf16 %v1922_v18, %v1922_v18 }
 0xdb9   : > { %2339 = vmatmul.mubr.msk.bf16.vlgmr.msra.gmra.mrb[24].mxu0 %vm937_vm9, %v1923_v19 }
 0xe8c   : > { %v1977_v22 = vpop.f32.mrb[24].mxu0 }
 0xe8d   : > { %v1990_v24 = vadd.f32 %v2190_v21, %v1977_v22  ;;  %v2340_v25 = vpop.f32.mrb[25].mxu0 }
 0xe8e   : > { %v1980_v26 = vpop.f32.mrb[26].mxu0 }
 0xe8f   : > { %1993 = vst.msk [vmem:[#allocation2 + $0x8] sm:$0xff] %vm823_vm1, %v1990_v24  ;;  %v2341_v28 = vpop.f32.mrb[27].mxu0 }
 0xe96   : > { %v1994_v29 = vld [vmem:[#allocation2 + $0x7] sm:$0xff]  ;;  %v1995_v0 = vld [vmem:[#allocation2 + $0xf] sm:$0x3] }
 0xe97   : > { %v2004_v30 = vrot.slane %v1994_v29, 2  ;;  %v2005_v31 = vrot.slane %v1995_v0, 2  ;;  %v1998_v32 = vrot.slane %v1994_v29, 1  ;;  %v1999_v33 = vrot.slane %v1995_v0, 1 }
 0xe99   : > { %v2006_v34 = vsel %vm844_vm4, %v2004_v30, %v2005_v31  ;;  %v2000_v35 = vsel %vm832_vm2, %v1998_v32, %v1999_v33 }
 0xe9a   : > { %2007 = vrot.lane.b32.xlu0 %v2006_v34, %s2473_s2  ;;  %2001 = vrot.lane.b32.xlu1 %v2000_v35, %s3052_s11  ;;  %s816_s2 = scalar_lea.vmem %s3021_s27, %s2141_s6 }
 0xf0c   : > { %v2008_v36 = vpop.permute.xlu0 %2007  ;;  %v2002_v37 = vpop.permute.xlu1 %2001 }
 0xf0d   : > { %v2010_v38 = vsel %vm823_vm1, %v1994_v29, %v2002_v37 }
 0xf0e   : > { %v2011_v39 = vsel %vm858_vm6, %v2010_v38, %v2008_v36 }
 0xf0f   : > { %v2012_v40 = vpack.c.bf16 %v2011_v39, %v2011_v39 }
 0xf11   : > { %2347 = vmatmul.mubr.msk.bf16.vlgmr.msra.gmra.mrb[20].mxu1 %vm874_vm7, %v2012_v40 }
 0xfe4   : > { %v2065_v42 = vpop.f32.mrb[20].mxu1 }
 0xfe5   : > { %v2078_v43 = vadd.f32 %v2194_v41, %v2065_v42  ;;  %v2348_v44 = vpop.f32.mrb[21].mxu1 }
 0xfe6   : > { %v2068_v45 = vpop.f32.mrb[22].mxu1 }
 0xfe7   : > { %2080 = vst.msk [vmem:[%s816_s2] sm:$0xff] %vm2079_vm0, %v2078_v43  ;;  %v2349_v46 = vpop.f32.mrb[23].mxu1 }
 0xfe8 PF: > { %s37_s7 = sadd.s32 1, %s2468_s7  }
 0xfe9   : > { %p34_p4 = scmp.ge.s32.totalorder %s37_s7, 4  }
 0xfeb   :  { %36 = sbr.rel (!%p34_p4) target bundleno = 13 (0xd), region = 162 }

</bundles_post_ra>
